<compile_context>
chip_gen: v6e
topology: v6e:2x2x1
jax: 0.10.0
libtpu: 0.0.40
codegen_flags: <defaults>
</compile_context>

<pallas_src>
import functools

import jax
import jax.numpy as jnp
from jax import lax
from jax.experimental import pallas as pl
from jax.experimental.pallas import tpu as pltpu


# ---------------------------------------------------------------------------
# Packed-parameter row layout (shared by make_params and the kernel).
# ---------------------------------------------------------------------------
def _offsets(I, H, O, S):
    r_xw = 0                      # I rows:  [0 | W_ih1.T row k]          (8H)
    r_bcat = r_xw + I             # 1 row :  [b2 | b1] (gate-interleaved) (8H)
    r_a = r_bcat + 1              # H rows:  [W_ih2.T row k | W_hh1.T row k]
    r_b = r_a + H                 # H rows:  [W_hh2.T row k | 0]
    r_fc = r_b + H                # O*S rows: [W_fc[o, t*H:(t+1)*H] | 0]  (2H)
    r_fcb = r_fc + O * S          # 1 row :  b_fc in cols [0, O)
    n_rows = r_fcb + 1
    return r_xw, r_bcat, r_a, r_b, r_fc, r_fcb, n_rows


def _tree_sum(terms):
    """Balanced pairwise add tree (shortens the dependent-FMA chain)."""
    terms = list(terms)
    while len(terms) > 1:
        nxt = [terms[i] + terms[i + 1] for i in range(0, len(terms) - 1, 2)]
        if len(terms) % 2:
            nxt.append(terms[-1])
        terms = nxt
    return terms[0]


# ---------------------------------------------------------------------------
# Kernel: whole forward pass, everything VMEM-resident, no grid.
# ---------------------------------------------------------------------------
def _lstm_kernel(x_ref, p_ref, out_ref, *, S, B, I, H, O):
    """
    x_ref  : (B, S*I)     input in native batch-major layout
    p_ref  : (rows, 8H)   packed weights (gate lanes interleaved, i/f/o lanes
                          pre-scaled by 0.5 for the tanh-only sigmoid trick)
    out_ref: (B, O)
    """
    H2, H4, H8 = 2 * H, 4 * H, 8 * H
    r_xw, r_bcat, r_a, r_b, r_fc, r_fcb, _ = _offsets(I, H, O, S)

    X = x_ref[...]                       # (B, S*I)
    P = p_ref[...]                       # (rows, 8H)

    # ---- hoisted weight-row slices (independent of the recurrence) ----
    Xw = [P[r_xw + k:r_xw + k + 1, :] for k in range(I)]     # (1, 8H)
    bcat = P[r_bcat:r_bcat + 1, :]                           # (1, 8H)
    A = [P[r_a + k:r_a + k + 1, :] for k in range(H)]        # h1 -> [z2 | z1']
    Bw = [P[r_b + k:r_b + k + 1, :] for k in range(H)]       # h2 -> [z2 | 0 ]
    fc = [[P[r_fc + o * S + t:r_fc + o * S + t + 1, 0:H2]
           for t in range(S)] for o in range(O)]             # (1, 2H), right half 0
    fcb = P[r_fcb:r_fcb + 1, 0:O]                            # (1, O)

    # ---- hoisted per-step bases: zb[t] = [b2 | b1 + x_t @ W_ih1.T] (scaled) ----
    zb = []
    for t in range(S):
        terms = [bcat] + [X[:, t * I + k: t * I + k + 1] * Xw[k] for k in range(I)]
        zb.append(_tree_sum(terms))                          # (B, 8H)

    # Lane layout reminder: columns are [i2 i1 | f2 f1 | g2 g1 | o2 o1], H each.
    # Combined states: cc = [c2 | c1], hh = [h2 | h1]  (B, 2H).

    # ---- prologue: layer-1 at t=0 (h1=c1=0 terms peeled) ----
    tz0 = jnp.tanh(zb[0])                                    # EUP push
    ic0 = tz0[:, 0:H2] * 0.5 + 0.5                           # [i2? , i1]
    gc0 = tz0[:, 2 * H2:3 * H2]                              # [g2? , g1]
    oc0 = tz0[:, 3 * H2:4 * H2] * 0.5 + 0.5                  # [o2? , o1]
    # trace-time constant mask (no runtime concat): keep only the layer-1 half
    right_mask = jnp.concatenate(
        [jnp.zeros((1, H), jnp.float32), jnp.ones((1, H), jnp.float32)], axis=-1)
    cc = ic0 * gc0 * right_mask                              # [0 | c1_0]
    hh = oc0 * jnp.tanh(cc)                                  # EUP push -> [0 | h1_0]

    # ---- fully unrolled skewed loop: step t does layer-2(t) + layer-1(t+1) ----
    accs = [None] * O
    for t in range(S):
        last = (t == S - 1)
        terms = [bcat if last else zb[t + 1]]
        terms += [hh[:, H + k:H + k + 1] * A[k] for k in range(H)]   # h1_t terms
        if t > 0:                                                    # h2_{t-1}=0 at t=0
            terms += [hh[:, k:k + 1] * Bw[k] for k in range(H)]
        z = _tree_sum(terms)                                         # (B, 8H)

        tz = jnp.tanh(z)                                             # EUP push (both layers)
        icat = tz[:, 0:H2] * 0.5 + 0.5                               # [i2 , i1]
        fcat = tz[:, H2:2 * H2] * 0.5 + 0.5                          # [f2 , f1]
        gcat = tz[:, 2 * H2:3 * H2]                                  # [g2 , g1]
        ocat = tz[:, 3 * H2:4 * H2] * 0.5 + 0.5                      # [o2 , o1]

        cc = fcat * cc + icat * gcat                                 # [c2_t | c1_{t+1}]
        hh = ocat * jnp.tanh(cc)                                     # EUP push -> [h2_t | h1_{t+1}]
        # (at the last step the right half is unused garbage; it is multiplied
        #  by the zero-padded half of the FC row below, so it never leaks.)

        # Fused flatten+Linear: full-width FMA, right half of fc row is zero.
        for o in range(O):
            contrib = hh * fc[o][t]
            accs[o] = contrib if t == 0 else accs[o] + contrib

    # ---- final lane-reduce + bias + output sigmoid ----
    cols = [jnp.sum(accs[o], axis=-1, keepdims=True) + fcb[:, o:o + 1]
            for o in range(O)]
    y = cols[0] if O == 1 else jnp.concatenate(cols, axis=-1)
    out_ref[...] = jax.nn.sigmoid(y)


# ---------------------------------------------------------------------------
# Wrapper (zero wrapper-side data movement; reshape of contiguous x is free).
# ---------------------------------------------------------------------------
def lstm_pallas(x, packed, *, output_size=1):
    """x: (batch, seq, input_size) f32 -> (batch, output_size) f32."""
    B, S, I = x.shape
    H = packed.shape[1] // 8
    x2 = x.reshape(B, S * I)
    kernel = functools.partial(_lstm_kernel, S=S, B=B, I=I, H=H, O=output_size)
    vmem = pl.BlockSpec(memory_space=pltpu.MemorySpace.VMEM)
    return pl.pallas_call(
        kernel,
        out_shape=jax.ShapeDtypeStruct((B, output_size), jnp.float32),
        in_specs=[vmem, vmem],
        out_specs=vmem,
    )(x2, packed)


# ---------------------------------------------------------------------------
# Parameter generation + offline packing.
# ---------------------------------------------------------------------------
def make_params(key, input_size, hidden_size, output_size, seq_len):
    """Synthetic PyTorch-layout parameters + the packed kernel operand."""
    H, I, O, S = hidden_size, input_size, output_size, seq_len
    k = 1.0 / jnp.sqrt(jnp.float32(H))
    keys = jax.random.split(key, 10)
    u = lambda kk, shape: jax.random.uniform(kk, shape, jnp.float32, -k, k)

    # PyTorch nn.LSTM / nn.Linear parameter shapes.
    w_ih1 = u(keys[0], (4 * H, I)); w_hh1 = u(keys[1], (4 * H, H))
    b_ih1 = u(keys[2], (4 * H,));   b_hh1 = u(keys[3], (4 * H,))
    w_ih2 = u(keys[4], (4 * H, H)); w_hh2 = u(keys[5], (4 * H, H))
    b_ih2 = u(keys[6], (4 * H,));   b_hh2 = u(keys[7], (4 * H,))
    w_fc = u(keys[8], (O, H * S));  b_fc = u(keys[9], (O,))

    # 0.5 pre-scale on i/f/o gate columns (tanh-only sigmoid trick); g stays 1.
    scale4 = jnp.concatenate([jnp.full((2 * H,), 0.5, jnp.float32),
                              jnp.ones((H,), jnp.float32),
                              jnp.full((H,), 0.5, jnp.float32)])

    w_ih1t = w_ih1.T * scale4      # (I, 4H)
    w_hh1t = w_hh1.T * scale4      # (H, 4H)
    w_ih2t = w_ih2.T * scale4      # (H, 4H)
    w_hh2t = w_hh2.T * scale4      # (H, 4H)
    b1s = (b_ih1 + b_hh1) * scale4
    b2s = (b_ih2 + b_hh2) * scale4

    def interleave(v2, v1):
        # per-gate interleave of layer-2 / layer-1 4H vectors -> 8H:
        # [i2 i1 | f2 f1 | g2 g1 | o2 o1]
        segs = []
        for g in range(4):
            segs.append(v2[..., g * H:(g + 1) * H])
            segs.append(v1[..., g * H:(g + 1) * H])
        return jnp.concatenate(segs, axis=-1)

    z_i4 = jnp.zeros((I, 4 * H), jnp.float32)
    z_h4 = jnp.zeros((H, 4 * H), jnp.float32)

    Xw = interleave(z_i4, w_ih1t)                      # (I, 8H)
    bcat = interleave(b2s[None, :], b1s[None, :])      # (1, 8H)
    A = interleave(w_ih2t, w_hh1t)                     # (H, 8H)
    Bw = interleave(w_hh2t, z_h4)                      # (H, 8H)

    fc_rows = jnp.zeros((O * S, 8 * H), jnp.float32)
    fc_rows = fc_rows.at[:, :H].set(w_fc.reshape(O * S, H))   # right half stays 0
    fcb_row = jnp.zeros((1, 8 * H), jnp.float32).at[0, :O].set(b_fc)

    packed = jnp.concatenate([Xw, bcat, A, Bw, fc_rows, fcb_row], axis=0)
    assert packed.shape[0] == _offsets(I, H, O, S)[-1]
    pad = (-packed.shape[0]) % 8
    if pad:
        packed = jnp.concatenate(
            [packed, jnp.zeros((pad, 8 * H), jnp.float32)], axis=0)

    return {"packed": packed.astype(jnp.float32),
            "w_ih1": w_ih1, "w_hh1": w_hh1, "b_ih1": b_ih1, "b_hh1": b_hh1,
            "w_ih2": w_ih2, "w_hh2": w_hh2, "b_ih2": b_ih2, "b_hh2": b_hh2,
            "w_fc": w_fc, "b_fc": b_fc}


# ---------------------------------------------------------------------------
# Pure-JAX reference mirroring the PyTorch forward (uses the RAW weights,
# standard sigmoid — fully independent of the kernel's packing/scaling tricks).
# ---------------------------------------------------------------------------
def lstm_reference(x, params):
    B, S, I = x.shape
    H = params["w_hh1"].shape[1]
    w_ih1t = params["w_ih1"].T; w_hh1t = params["w_hh1"].T
    w_ih2t = params["w_ih2"].T; w_hh2t = params["w_hh2"].T
    b1 = params["b_ih1"] + params["b_hh1"]
    b2 = params["b_ih2"] + params["b_hh2"]
    w_fc, b_fc = params["w_fc"], params["b_fc"]

    def cell(x_t, h, c, w_iht, w_hht, b):
        z = x_t @ w_iht + h @ w_hht + b
        i = jax.nn.sigmoid(z[:, 0 * H:1 * H])
        f = jax.nn.sigmoid(z[:, 1 * H:2 * H])
        g = jnp.tanh(z[:, 2 * H:3 * H])
        o = jax.nn.sigmoid(z[:, 3 * H:4 * H])
        c = f * c + i * g
        return o * jnp.tanh(c), c

    x_tm = jnp.transpose(x, (1, 0, 2))   # (S, B, I)

    def scan_fn(carry, x_t):
        h1, c1, h2, c2 = carry
        h1, c1 = cell(x_t, h1, c1, w_ih1t, w_hh1t, b1)
        h2, c2 = cell(h1, h2, c2, w_ih2t, w_hh2t, b2)
        return (h1, c1, h2, c2), h2

    z0 = jnp.zeros((B, H), jnp.float32)
    _, hs = lax.scan(scan_fn, (z0, z0, z0, z0), x_tm)        # (S, B, H)
    flat = jnp.transpose(hs, (1, 0, 2)).reshape(B, -1)       # (B, S*H)
    return jax.nn.sigmoid(flat @ w_fc.T + b_fc)


if __name__ == "__main__":
    # Small shapes consistent with the module: lstm(input_size=2, hidden_size=4,
    # output_size=1, num_layer=2, seq_len=8); batch=2.
    INPUT_SIZE, HIDDEN_SIZE, OUTPUT_SIZE, SEQ_LEN, BATCH = 2, 4, 1, 8, 2

    key = jax.random.PRNGKey(0)
    kx, kp = jax.random.split(key)
    x = jax.random.normal(kx, (BATCH, SEQ_LEN, INPUT_SIZE), jnp.float32)
    params = make_params(kp, INPUT_SIZE, HIDDEN_SIZE, OUTPUT_SIZE, SEQ_LEN)

    run = jax.jit(functools.partial(lstm_pallas, output_size=OUTPUT_SIZE))
    out = jax.block_until_ready(run(x, params["packed"]))
    ref = jax.block_until_ready(lstm_reference(x, params))

    assert out.shape == (BATCH, OUTPUT_SIZE)
    assert bool(jnp.allclose(out, ref, rtol=1e-4, atol=1e-4)), (out, ref)
    print("KERNEL_OK")
</pallas_src>

<mosaic_0001>
module attributes {stable_mosaic.version = 11 : i64} {
  func.func @_lstm_kernel(%arg0: memref<2x16xf32, #tpu.memory_space<vmem>>, %arg1: memref<24x32xf32, #tpu.memory_space<vmem>>, %arg2: memref<2x1xf32, #tpu.memory_space<vmem>>) attributes {dimension_semantics = [], scalar_prefetch = 0 : i64, scratch_operands = 0 : i64, tpu.core_type = #tpu.core_type<tc>} {
    %c0 = arith.constant 0 : index
    %c0_0 = arith.constant 0 : index
    %0 = vector.load %arg0[%c0, %c0_0] : memref<2x16xf32, #tpu.memory_space<vmem>>, vector<2x16xf32>
    %c0_1 = arith.constant 0 : index
    %c0_2 = arith.constant 0 : index
    %1 = vector.load %arg1[%c0_1, %c0_2] : memref<24x32xf32, #tpu.memory_space<vmem>>, vector<24x32xf32>
    %2 = vector.extract_strided_slice %1 {offsets = [0, 0], sizes = [1, 32], strides = [1, 1]} : vector<24x32xf32> to vector<1x32xf32>
    %3 = vector.extract_strided_slice %1 {offsets = [1, 0], sizes = [1, 32], strides = [1, 1]} : vector<24x32xf32> to vector<1x32xf32>
    %4 = vector.extract_strided_slice %1 {offsets = [2, 0], sizes = [1, 32], strides = [1, 1]} : vector<24x32xf32> to vector<1x32xf32>
    %5 = vector.extract_strided_slice %1 {offsets = [3, 0], sizes = [1, 32], strides = [1, 1]} : vector<24x32xf32> to vector<1x32xf32>
    %6 = vector.extract_strided_slice %1 {offsets = [4, 0], sizes = [1, 32], strides = [1, 1]} : vector<24x32xf32> to vector<1x32xf32>
    %7 = vector.extract_strided_slice %1 {offsets = [5, 0], sizes = [1, 32], strides = [1, 1]} : vector<24x32xf32> to vector<1x32xf32>
    %8 = vector.extract_strided_slice %1 {offsets = [6, 0], sizes = [1, 32], strides = [1, 1]} : vector<24x32xf32> to vector<1x32xf32>
    %9 = vector.extract_strided_slice %1 {offsets = [7, 0], sizes = [1, 32], strides = [1, 1]} : vector<24x32xf32> to vector<1x32xf32>
    %10 = vector.extract_strided_slice %1 {offsets = [8, 0], sizes = [1, 32], strides = [1, 1]} : vector<24x32xf32> to vector<1x32xf32>
    %11 = vector.extract_strided_slice %1 {offsets = [9, 0], sizes = [1, 32], strides = [1, 1]} : vector<24x32xf32> to vector<1x32xf32>
    %12 = vector.extract_strided_slice %1 {offsets = [10, 0], sizes = [1, 32], strides = [1, 1]} : vector<24x32xf32> to vector<1x32xf32>
    %13 = vector.extract_strided_slice %1 {offsets = [11, 0], sizes = [1, 8], strides = [1, 1]} : vector<24x32xf32> to vector<1x8xf32>
    %14 = vector.extract_strided_slice %1 {offsets = [12, 0], sizes = [1, 8], strides = [1, 1]} : vector<24x32xf32> to vector<1x8xf32>
    %15 = vector.extract_strided_slice %1 {offsets = [13, 0], sizes = [1, 8], strides = [1, 1]} : vector<24x32xf32> to vector<1x8xf32>
    %16 = vector.extract_strided_slice %1 {offsets = [14, 0], sizes = [1, 8], strides = [1, 1]} : vector<24x32xf32> to vector<1x8xf32>
    %17 = vector.extract_strided_slice %1 {offsets = [15, 0], sizes = [1, 8], strides = [1, 1]} : vector<24x32xf32> to vector<1x8xf32>
    %18 = vector.extract_strided_slice %1 {offsets = [16, 0], sizes = [1, 8], strides = [1, 1]} : vector<24x32xf32> to vector<1x8xf32>
    %19 = vector.extract_strided_slice %1 {offsets = [17, 0], sizes = [1, 8], strides = [1, 1]} : vector<24x32xf32> to vector<1x8xf32>
    %20 = vector.extract_strided_slice %1 {offsets = [18, 0], sizes = [1, 8], strides = [1, 1]} : vector<24x32xf32> to vector<1x8xf32>
    %21 = vector.extract_strided_slice %1 {offsets = [19, 0], sizes = [1, 1], strides = [1, 1]} : vector<24x32xf32> to vector<1x1xf32>
    %22 = vector.extract_strided_slice %0 {offsets = [0, 0], sizes = [2, 1], strides = [1, 1]} : vector<2x16xf32> to vector<2x1xf32>
    %23 = vector.broadcast %22 : vector<2x1xf32> to vector<2x32xf32>
    %24 = vector.broadcast %2 : vector<1x32xf32> to vector<2x32xf32>
    %25 = arith.mulf %23, %24 : vector<2x32xf32>
    %26 = vector.extract_strided_slice %0 {offsets = [0, 1], sizes = [2, 1], strides = [1, 1]} : vector<2x16xf32> to vector<2x1xf32>
    %27 = vector.broadcast %26 : vector<2x1xf32> to vector<2x32xf32>
    %28 = vector.broadcast %3 : vector<1x32xf32> to vector<2x32xf32>
    %29 = arith.mulf %27, %28 : vector<2x32xf32>
    %30 = vector.broadcast %4 : vector<1x32xf32> to vector<2x32xf32>
    %31 = arith.addf %30, %25 : vector<2x32xf32>
    %32 = arith.addf %31, %29 : vector<2x32xf32>
    %33 = vector.extract_strided_slice %0 {offsets = [0, 2], sizes = [2, 1], strides = [1, 1]} : vector<2x16xf32> to vector<2x1xf32>
    %34 = vector.broadcast %33 : vector<2x1xf32> to vector<2x32xf32>
    %35 = vector.broadcast %2 : vector<1x32xf32> to vector<2x32xf32>
    %36 = arith.mulf %34, %35 : vector<2x32xf32>
    %37 = vector.extract_strided_slice %0 {offsets = [0, 3], sizes = [2, 1], strides = [1, 1]} : vector<2x16xf32> to vector<2x1xf32>
    %38 = vector.broadcast %37 : vector<2x1xf32> to vector<2x32xf32>
    %39 = vector.broadcast %3 : vector<1x32xf32> to vector<2x32xf32>
    %40 = arith.mulf %38, %39 : vector<2x32xf32>
    %41 = vector.broadcast %4 : vector<1x32xf32> to vector<2x32xf32>
    %42 = arith.addf %41, %36 : vector<2x32xf32>
    %43 = arith.addf %42, %40 : vector<2x32xf32>
    %44 = vector.extract_strided_slice %0 {offsets = [0, 4], sizes = [2, 1], strides = [1, 1]} : vector<2x16xf32> to vector<2x1xf32>
    %45 = vector.broadcast %44 : vector<2x1xf32> to vector<2x32xf32>
    %46 = vector.broadcast %2 : vector<1x32xf32> to vector<2x32xf32>
    %47 = arith.mulf %45, %46 : vector<2x32xf32>
    %48 = vector.extract_strided_slice %0 {offsets = [0, 5], sizes = [2, 1], strides = [1, 1]} : vector<2x16xf32> to vector<2x1xf32>
    %49 = vector.broadcast %48 : vector<2x1xf32> to vector<2x32xf32>
    %50 = vector.broadcast %3 : vector<1x32xf32> to vector<2x32xf32>
    %51 = arith.mulf %49, %50 : vector<2x32xf32>
    %52 = vector.broadcast %4 : vector<1x32xf32> to vector<2x32xf32>
    %53 = arith.addf %52, %47 : vector<2x32xf32>
    %54 = arith.addf %53, %51 : vector<2x32xf32>
    %55 = vector.extract_strided_slice %0 {offsets = [0, 6], sizes = [2, 1], strides = [1, 1]} : vector<2x16xf32> to vector<2x1xf32>
    %56 = vector.broadcast %55 : vector<2x1xf32> to vector<2x32xf32>
    %57 = vector.broadcast %2 : vector<1x32xf32> to vector<2x32xf32>
    %58 = arith.mulf %56, %57 : vector<2x32xf32>
    %59 = vector.extract_strided_slice %0 {offsets = [0, 7], sizes = [2, 1], strides = [1, 1]} : vector<2x16xf32> to vector<2x1xf32>
    %60 = vector.broadcast %59 : vector<2x1xf32> to vector<2x32xf32>
    %61 = vector.broadcast %3 : vector<1x32xf32> to vector<2x32xf32>
    %62 = arith.mulf %60, %61 : vector<2x32xf32>
    %63 = vector.broadcast %4 : vector<1x32xf32> to vector<2x32xf32>
    %64 = arith.addf %63, %58 : vector<2x32xf32>
    %65 = arith.addf %64, %62 : vector<2x32xf32>
    %66 = vector.extract_strided_slice %0 {offsets = [0, 8], sizes = [2, 1], strides = [1, 1]} : vector<2x16xf32> to vector<2x1xf32>
    %67 = vector.broadcast %66 : vector<2x1xf32> to vector<2x32xf32>
    %68 = vector.broadcast %2 : vector<1x32xf32> to vector<2x32xf32>
    %69 = arith.mulf %67, %68 : vector<2x32xf32>
    %70 = vector.extract_strided_slice %0 {offsets = [0, 9], sizes = [2, 1], strides = [1, 1]} : vector<2x16xf32> to vector<2x1xf32>
    %71 = vector.broadcast %70 : vector<2x1xf32> to vector<2x32xf32>
    %72 = vector.broadcast %3 : vector<1x32xf32> to vector<2x32xf32>
    %73 = arith.mulf %71, %72 : vector<2x32xf32>
    %74 = vector.broadcast %4 : vector<1x32xf32> to vector<2x32xf32>
    %75 = arith.addf %74, %69 : vector<2x32xf32>
    %76 = arith.addf %75, %73 : vector<2x32xf32>
    %77 = vector.extract_strided_slice %0 {offsets = [0, 10], sizes = [2, 1], strides = [1, 1]} : vector<2x16xf32> to vector<2x1xf32>
    %78 = vector.broadcast %77 : vector<2x1xf32> to vector<2x32xf32>
    %79 = vector.broadcast %2 : vector<1x32xf32> to vector<2x32xf32>
    %80 = arith.mulf %78, %79 : vector<2x32xf32>
    %81 = vector.extract_strided_slice %0 {offsets = [0, 11], sizes = [2, 1], strides = [1, 1]} : vector<2x16xf32> to vector<2x1xf32>
    %82 = vector.broadcast %81 : vector<2x1xf32> to vector<2x32xf32>
    %83 = vector.broadcast %3 : vector<1x32xf32> to vector<2x32xf32>
    %84 = arith.mulf %82, %83 : vector<2x32xf32>
    %85 = vector.broadcast %4 : vector<1x32xf32> to vector<2x32xf32>
    %86 = arith.addf %85, %80 : vector<2x32xf32>
    %87 = arith.addf %86, %84 : vector<2x32xf32>
    %88 = vector.extract_strided_slice %0 {offsets = [0, 12], sizes = [2, 1], strides = [1, 1]} : vector<2x16xf32> to vector<2x1xf32>
    %89 = vector.broadcast %88 : vector<2x1xf32> to vector<2x32xf32>
    %90 = vector.broadcast %2 : vector<1x32xf32> to vector<2x32xf32>
    %91 = arith.mulf %89, %90 : vector<2x32xf32>
    %92 = vector.extract_strided_slice %0 {offsets = [0, 13], sizes = [2, 1], strides = [1, 1]} : vector<2x16xf32> to vector<2x1xf32>
    %93 = vector.broadcast %92 : vector<2x1xf32> to vector<2x32xf32>
    %94 = vector.broadcast %3 : vector<1x32xf32> to vector<2x32xf32>
    %95 = arith.mulf %93, %94 : vector<2x32xf32>
    %96 = vector.broadcast %4 : vector<1x32xf32> to vector<2x32xf32>
    %97 = arith.addf %96, %91 : vector<2x32xf32>
    %98 = arith.addf %97, %95 : vector<2x32xf32>
    %99 = vector.extract_strided_slice %0 {offsets = [0, 14], sizes = [2, 1], strides = [1, 1]} : vector<2x16xf32> to vector<2x1xf32>
    %100 = vector.broadcast %99 : vector<2x1xf32> to vector<2x32xf32>
    %101 = vector.broadcast %2 : vector<1x32xf32> to vector<2x32xf32>
    %102 = arith.mulf %100, %101 : vector<2x32xf32>
    %103 = vector.extract_strided_slice %0 {offsets = [0, 15], sizes = [2, 1], strides = [1, 1]} : vector<2x16xf32> to vector<2x1xf32>
    %104 = vector.broadcast %103 : vector<2x1xf32> to vector<2x32xf32>
    %105 = vector.broadcast %3 : vector<1x32xf32> to vector<2x32xf32>
    %106 = arith.mulf %104, %105 : vector<2x32xf32>
    %107 = vector.broadcast %4 : vector<1x32xf32> to vector<2x32xf32>
    %108 = arith.addf %107, %102 : vector<2x32xf32>
    %109 = arith.addf %108, %106 : vector<2x32xf32>
    %110 = math.tanh %32 : vector<2x32xf32>
    %111 = vector.extract_strided_slice %110 {offsets = [0, 0], sizes = [2, 8], strides = [1, 1]} : vector<2x32xf32> to vector<2x8xf32>
    %cst = arith.constant 5.000000e-01 : f32
    %112 = vector.broadcast %cst : f32 to vector<2x8xf32>
    %113 = arith.mulf %111, %112 : vector<2x8xf32>
    %cst_3 = arith.constant 5.000000e-01 : f32
    %114 = vector.broadcast %cst_3 : f32 to vector<2x8xf32>
    %115 = arith.addf %113, %114 : vector<2x8xf32>
    %116 = vector.extract_strided_slice %110 {offsets = [0, 16], sizes = [2, 8], strides = [1, 1]} : vector<2x32xf32> to vector<2x8xf32>
    %117 = vector.extract_strided_slice %110 {offsets = [0, 24], sizes = [2, 8], strides = [1, 1]} : vector<2x32xf32> to vector<2x8xf32>
    %cst_4 = arith.constant 5.000000e-01 : f32
    %118 = vector.broadcast %cst_4 : f32 to vector<2x8xf32>
    %119 = arith.mulf %117, %118 : vector<2x8xf32>
    %cst_5 = arith.constant 5.000000e-01 : f32
    %120 = vector.broadcast %cst_5 : f32 to vector<2x8xf32>
    %121 = arith.addf %119, %120 : vector<2x8xf32>
    %cst_6 = arith.constant 0.000000e+00 : f32
    %122 = vector.broadcast %cst_6 : f32 to vector<1x4xf32>
    %cst_7 = arith.constant 1.000000e+00 : f32
    %123 = vector.broadcast %cst_7 : f32 to vector<1x4xf32>
    %124 = tpu.concatenate %122, %123 in 1 : vector<1x4xf32>, vector<1x4xf32> -> vector<1x8xf32>
    %125 = arith.mulf %115, %116 : vector<2x8xf32>
    %126 = vector.broadcast %124 : vector<1x8xf32> to vector<2x8xf32>
    %127 = arith.mulf %125, %126 : vector<2x8xf32>
    %128 = math.tanh %127 : vector<2x8xf32>
    %129 = arith.mulf %121, %128 : vector<2x8xf32>
    %130 = vector.extract_strided_slice %129 {offsets = [0, 4], sizes = [2, 1], strides = [1, 1]} : vector<2x8xf32> to vector<2x1xf32>
    %131 = vector.broadcast %130 : vector<2x1xf32> to vector<2x32xf32>
    %132 = vector.broadcast %5 : vector<1x32xf32> to vector<2x32xf32>
    %133 = arith.mulf %131, %132 : vector<2x32xf32>
    %134 = vector.extract_strided_slice %129 {offsets = [0, 5], sizes = [2, 1], strides = [1, 1]} : vector<2x8xf32> to vector<2x1xf32>
    %135 = vector.broadcast %134 : vector<2x1xf32> to vector<2x32xf32>
    %136 = vector.broadcast %6 : vector<1x32xf32> to vector<2x32xf32>
    %137 = arith.mulf %135, %136 : vector<2x32xf32>
    %138 = vector.extract_strided_slice %129 {offsets = [0, 6], sizes = [2, 1], strides = [1, 1]} : vector<2x8xf32> to vector<2x1xf32>
    %139 = vector.broadcast %138 : vector<2x1xf32> to vector<2x32xf32>
    %140 = vector.broadcast %7 : vector<1x32xf32> to vector<2x32xf32>
    %141 = arith.mulf %139, %140 : vector<2x32xf32>
    %142 = vector.extract_strided_slice %129 {offsets = [0, 7], sizes = [2, 1], strides = [1, 1]} : vector<2x8xf32> to vector<2x1xf32>
    %143 = vector.broadcast %142 : vector<2x1xf32> to vector<2x32xf32>
    %144 = vector.broadcast %8 : vector<1x32xf32> to vector<2x32xf32>
    %145 = arith.mulf %143, %144 : vector<2x32xf32>
    %146 = arith.addf %43, %133 : vector<2x32xf32>
    %147 = arith.addf %137, %141 : vector<2x32xf32>
    %148 = arith.addf %146, %147 : vector<2x32xf32>
    %149 = arith.addf %148, %145 : vector<2x32xf32>
    %150 = math.tanh %149 : vector<2x32xf32>
    %151 = vector.extract_strided_slice %150 {offsets = [0, 0], sizes = [2, 8], strides = [1, 1]} : vector<2x32xf32> to vector<2x8xf32>
    %cst_8 = arith.constant 5.000000e-01 : f32
    %152 = vector.broadcast %cst_8 : f32 to vector<2x8xf32>
    %153 = arith.mulf %151, %152 : vector<2x8xf32>
    %cst_9 = arith.constant 5.000000e-01 : f32
    %154 = vector.broadcast %cst_9 : f32 to vector<2x8xf32>
    %155 = arith.addf %153, %154 : vector<2x8xf32>
    %156 = vector.extract_strided_slice %150 {offsets = [0, 8], sizes = [2, 8], strides = [1, 1]} : vector<2x32xf32> to vector<2x8xf32>
    %cst_10 = arith.constant 5.000000e-01 : f32
    %157 = vector.broadcast %cst_10 : f32 to vector<2x8xf32>
    %158 = arith.mulf %156, %157 : vector<2x8xf32>
    %cst_11 = arith.constant 5.000000e-01 : f32
    %159 = vector.broadcast %cst_11 : f32 to vector<2x8xf32>
    %160 = arith.addf %158, %159 : vector<2x8xf32>
    %161 = vector.extract_strided_slice %150 {offsets = [0, 16], sizes = [2, 8], strides = [1, 1]} : vector<2x32xf32> to vector<2x8xf32>
    %162 = vector.extract_strided_slice %150 {offsets = [0, 24], sizes = [2, 8], strides = [1, 1]} : vector<2x32xf32> to vector<2x8xf32>
    %cst_12 = arith.constant 5.000000e-01 : f32
    %163 = vector.broadcast %cst_12 : f32 to vector<2x8xf32>
    %164 = arith.mulf %162, %163 : vector<2x8xf32>
    %cst_13 = arith.constant 5.000000e-01 : f32
    %165 = vector.broadcast %cst_13 : f32 to vector<2x8xf32>
    %166 = arith.addf %164, %165 : vector<2x8xf32>
    %167 = arith.mulf %160, %127 : vector<2x8xf32>
    %168 = arith.mulf %155, %161 : vector<2x8xf32>
    %169 = arith.addf %167, %168 : vector<2x8xf32>
    %170 = math.tanh %169 : vector<2x8xf32>
    %171 = arith.mulf %166, %170 : vector<2x8xf32>
    %172 = vector.broadcast %13 : vector<1x8xf32> to vector<2x8xf32>
    %173 = arith.mulf %171, %172 : vector<2x8xf32>
    %174 = vector.extract_strided_slice %171 {offsets = [0, 4], sizes = [2, 1], strides = [1, 1]} : vector<2x8xf32> to vector<2x1xf32>
    %175 = vector.broadcast %174 : vector<2x1xf32> to vector<2x32xf32>
    %176 = vector.broadcast %5 : vector<1x32xf32> to vector<2x32xf32>
    %177 = arith.mulf %175, %176 : vector<2x32xf32>
    %178 = vector.extract_strided_slice %171 {offsets = [0, 5], sizes = [2, 1], strides = [1, 1]} : vector<2x8xf32> to vector<2x1xf32>
    %179 = vector.broadcast %178 : vector<2x1xf32> to vector<2x32xf32>
    %180 = vector.broadcast %6 : vector<1x32xf32> to vector<2x32xf32>
    %181 = arith.mulf %179, %180 : vector<2x32xf32>
    %182 = vector.extract_strided_slice %171 {offsets = [0, 6], sizes = [2, 1], strides = [1, 1]} : vector<2x8xf32> to vector<2x1xf32>
    %183 = vector.broadcast %182 : vector<2x1xf32> to vector<2x32xf32>
    %184 = vector.broadcast %7 : vector<1x32xf32> to vector<2x32xf32>
    %185 = arith.mulf %183, %184 : vector<2x32xf32>
    %186 = vector.extract_strided_slice %171 {offsets = [0, 7], sizes = [2, 1], strides = [1, 1]} : vector<2x8xf32> to vector<2x1xf32>
    %187 = vector.broadcast %186 : vector<2x1xf32> to vector<2x32xf32>
    %188 = vector.broadcast %8 : vector<1x32xf32> to vector<2x32xf32>
    %189 = arith.mulf %187, %188 : vector<2x32xf32>
    %190 = vector.extract_strided_slice %171 {offsets = [0, 0], sizes = [2, 1], strides = [1, 1]} : vector<2x8xf32> to vector<2x1xf32>
    %191 = vector.broadcast %190 : vector<2x1xf32> to vector<2x32xf32>
    %192 = vector.broadcast %9 : vector<1x32xf32> to vector<2x32xf32>
    %193 = arith.mulf %191, %192 : vector<2x32xf32>
    %194 = vector.extract_strided_slice %171 {offsets = [0, 1], sizes = [2, 1], strides = [1, 1]} : vector<2x8xf32> to vector<2x1xf32>
    %195 = vector.broadcast %194 : vector<2x1xf32> to vector<2x32xf32>
    %196 = vector.broadcast %10 : vector<1x32xf32> to vector<2x32xf32>
    %197 = arith.mulf %195, %196 : vector<2x32xf32>
    %198 = vector.extract_strided_slice %171 {offsets = [0, 2], sizes = [2, 1], strides = [1, 1]} : vector<2x8xf32> to vector<2x1xf32>
    %199 = vector.broadcast %198 : vector<2x1xf32> to vector<2x32xf32>
    %200 = vector.broadcast %11 : vector<1x32xf32> to vector<2x32xf32>
    %201 = arith.mulf %199, %200 : vector<2x32xf32>
    %202 = vector.extract_strided_slice %171 {offsets = [0, 3], sizes = [2, 1], strides = [1, 1]} : vector<2x8xf32> to vector<2x1xf32>
    %203 = vector.broadcast %202 : vector<2x1xf32> to vector<2x32xf32>
    %204 = vector.broadcast %12 : vector<1x32xf32> to vector<2x32xf32>
    %205 = arith.mulf %203, %204 : vector<2x32xf32>
    %206 = arith.addf %54, %177 : vector<2x32xf32>
    %207 = arith.addf %181, %185 : vector<2x32xf32>
    %208 = arith.addf %189, %193 : vector<2x32xf32>
    %209 = arith.addf %197, %201 : vector<2x32xf32>
    %210 = arith.addf %206, %207 : vector<2x32xf32>
    %211 = arith.addf %208, %209 : vector<2x32xf32>
    %212 = arith.addf %210, %211 : vector<2x32xf32>
    %213 = arith.addf %212, %205 : vector<2x32xf32>
    %214 = math.tanh %213 : vector<2x32xf32>
    %215 = vector.extract_strided_slice %214 {offsets = [0, 0], sizes = [2, 8], strides = [1, 1]} : vector<2x32xf32> to vector<2x8xf32>
    %cst_14 = arith.constant 5.000000e-01 : f32
    %216 = vector.broadcast %cst_14 : f32 to vector<2x8xf32>
    %217 = arith.mulf %215, %216 : vector<2x8xf32>
    %cst_15 = arith.constant 5.000000e-01 : f32
    %218 = vector.broadcast %cst_15 : f32 to vector<2x8xf32>
    %219 = arith.addf %217, %218 : vector<2x8xf32>
    %220 = vector.extract_strided_slice %214 {offsets = [0, 8], sizes = [2, 8], strides = [1, 1]} : vector<2x32xf32> to vector<2x8xf32>
    %cst_16 = arith.constant 5.000000e-01 : f32
    %221 = vector.broadcast %cst_16 : f32 to vector<2x8xf32>
    %222 = arith.mulf %220, %221 : vector<2x8xf32>
    %cst_17 = arith.constant 5.000000e-01 : f32
    %223 = vector.broadcast %cst_17 : f32 to vector<2x8xf32>
    %224 = arith.addf %222, %223 : vector<2x8xf32>
    %225 = vector.extract_strided_slice %214 {offsets = [0, 16], sizes = [2, 8], strides = [1, 1]} : vector<2x32xf32> to vector<2x8xf32>
    %226 = vector.extract_strided_slice %214 {offsets = [0, 24], sizes = [2, 8], strides = [1, 1]} : vector<2x32xf32> to vector<2x8xf32>
    %cst_18 = arith.constant 5.000000e-01 : f32
    %227 = vector.broadcast %cst_18 : f32 to vector<2x8xf32>
    %228 = arith.mulf %226, %227 : vector<2x8xf32>
    %cst_19 = arith.constant 5.000000e-01 : f32
    %229 = vector.broadcast %cst_19 : f32 to vector<2x8xf32>
    %230 = arith.addf %228, %229 : vector<2x8xf32>
    %231 = arith.mulf %224, %169 : vector<2x8xf32>
    %232 = arith.mulf %219, %225 : vector<2x8xf32>
    %233 = arith.addf %231, %232 : vector<2x8xf32>
    %234 = math.tanh %233 : vector<2x8xf32>
    %235 = arith.mulf %230, %234 : vector<2x8xf32>
    %236 = vector.broadcast %14 : vector<1x8xf32> to vector<2x8xf32>
    %237 = arith.mulf %235, %236 : vector<2x8xf32>
    %238 = arith.addf %173, %237 : vector<2x8xf32>
    %239 = vector.extract_strided_slice %235 {offsets = [0, 4], sizes = [2, 1], strides = [1, 1]} : vector<2x8xf32> to vector<2x1xf32>
    %240 = vector.broadcast %239 : vector<2x1xf32> to vector<2x32xf32>
    %241 = vector.broadcast %5 : vector<1x32xf32> to vector<2x32xf32>
    %242 = arith.mulf %240, %241 : vector<2x32xf32>
    %243 = vector.extract_strided_slice %235 {offsets = [0, 5], sizes = [2, 1], strides = [1, 1]} : vector<2x8xf32> to vector<2x1xf32>
    %244 = vector.broadcast %243 : vector<2x1xf32> to vector<2x32xf32>
    %245 = vector.broadcast %6 : vector<1x32xf32> to vector<2x32xf32>
    %246 = arith.mulf %244, %245 : vector<2x32xf32>
    %247 = vector.extract_strided_slice %235 {offsets = [0, 6], sizes = [2, 1], strides = [1, 1]} : vector<2x8xf32> to vector<2x1xf32>
    %248 = vector.broadcast %247 : vector<2x1xf32> to vector<2x32xf32>
    %249 = vector.broadcast %7 : vector<1x32xf32> to vector<2x32xf32>
    %250 = arith.mulf %248, %249 : vector<2x32xf32>
    %251 = vector.extract_strided_slice %235 {offsets = [0, 7], sizes = [2, 1], strides = [1, 1]} : vector<2x8xf32> to vector<2x1xf32>
    %252 = vector.broadcast %251 : vector<2x1xf32> to vector<2x32xf32>
    %253 = vector.broadcast %8 : vector<1x32xf32> to vector<2x32xf32>
    %254 = arith.mulf %252, %253 : vector<2x32xf32>
    %255 = vector.extract_strided_slice %235 {offsets = [0, 0], sizes = [2, 1], strides = [1, 1]} : vector<2x8xf32> to vector<2x1xf32>
    %256 = vector.broadcast %255 : vector<2x1xf32> to vector<2x32xf32>
    %257 = vector.broadcast %9 : vector<1x32xf32> to vector<2x32xf32>
    %258 = arith.mulf %256, %257 : vector<2x32xf32>
    %259 = vector.extract_strided_slice %235 {offsets = [0, 1], sizes = [2, 1], strides = [1, 1]} : vector<2x8xf32> to vector<2x1xf32>
    %260 = vector.broadcast %259 : vector<2x1xf32> to vector<2x32xf32>
    %261 = vector.broadcast %10 : vector<1x32xf32> to vector<2x32xf32>
    %262 = arith.mulf %260, %261 : vector<2x32xf32>
    %263 = vector.extract_strided_slice %235 {offsets = [0, 2], sizes = [2, 1], strides = [1, 1]} : vector<2x8xf32> to vector<2x1xf32>
    %264 = vector.broadcast %263 : vector<2x1xf32> to vector<2x32xf32>
    %265 = vector.broadcast %11 : vector<1x32xf32> to vector<2x32xf32>
    %266 = arith.mulf %264, %265 : vector<2x32xf32>
    %267 = vector.extract_strided_slice %235 {offsets = [0, 3], sizes = [2, 1], strides = [1, 1]} : vector<2x8xf32> to vector<2x1xf32>
    %268 = vector.broadcast %267 : vector<2x1xf32> to vector<2x32xf32>
    %269 = vector.broadcast %12 : vector<1x32xf32> to vector<2x32xf32>
    %270 = arith.mulf %268, %269 : vector<2x32xf32>
    %271 = arith.addf %65, %242 : vector<2x32xf32>
    %272 = arith.addf %246, %250 : vector<2x32xf32>
    %273 = arith.addf %254, %258 : vector<2x32xf32>
    %274 = arith.addf %262, %266 : vector<2x32xf32>
    %275 = arith.addf %271, %272 : vector<2x32xf32>
    %276 = arith.addf %273, %274 : vector<2x32xf32>
    %277 = arith.addf %275, %276 : vector<2x32xf32>
    %278 = arith.addf %277, %270 : vector<2x32xf32>
    %279 = math.tanh %278 : vector<2x32xf32>
    %280 = vector.extract_strided_slice %279 {offsets = [0, 0], sizes = [2, 8], strides = [1, 1]} : vector<2x32xf32> to vector<2x8xf32>
    %cst_20 = arith.constant 5.000000e-01 : f32
    %281 = vector.broadcast %cst_20 : f32 to vector<2x8xf32>
    %282 = arith.mulf %280, %281 : vector<2x8xf32>
    %cst_21 = arith.constant 5.000000e-01 : f32
    %283 = vector.broadcast %cst_21 : f32 to vector<2x8xf32>
    %284 = arith.addf %282, %283 : vector<2x8xf32>
    %285 = vector.extract_strided_slice %279 {offsets = [0, 8], sizes = [2, 8], strides = [1, 1]} : vector<2x32xf32> to vector<2x8xf32>
    %cst_22 = arith.constant 5.000000e-01 : f32
    %286 = vector.broadcast %cst_22 : f32 to vector<2x8xf32>
    %287 = arith.mulf %285, %286 : vector<2x8xf32>
    %cst_23 = arith.constant 5.000000e-01 : f32
    %288 = vector.broadcast %cst_23 : f32 to vector<2x8xf32>
    %289 = arith.addf %287, %288 : vector<2x8xf32>
    %290 = vector.extract_strided_slice %279 {offsets = [0, 16], sizes = [2, 8], strides = [1, 1]} : vector<2x32xf32> to vector<2x8xf32>
    %291 = vector.extract_strided_slice %279 {offsets = [0, 24], sizes = [2, 8], strides = [1, 1]} : vector<2x32xf32> to vector<2x8xf32>
    %cst_24 = arith.constant 5.000000e-01 : f32
    %292 = vector.broadcast %cst_24 : f32 to vector<2x8xf32>
    %293 = arith.mulf %291, %292 : vector<2x8xf32>
    %cst_25 = arith.constant 5.000000e-01 : f32
    %294 = vector.broadcast %cst_25 : f32 to vector<2x8xf32>
    %295 = arith.addf %293, %294 : vector<2x8xf32>
    %296 = arith.mulf %289, %233 : vector<2x8xf32>
    %297 = arith.mulf %284, %290 : vector<2x8xf32>
    %298 = arith.addf %296, %297 : vector<2x8xf32>
    %299 = math.tanh %298 : vector<2x8xf32>
    %300 = arith.mulf %295, %299 : vector<2x8xf32>
    %301 = vector.broadcast %15 : vector<1x8xf32> to vector<2x8xf32>
    %302 = arith.mulf %300, %301 : vector<2x8xf32>
    %303 = arith.addf %238, %302 : vector<2x8xf32>
    %304 = vector.extract_strided_slice %300 {offsets = [0, 4], sizes = [2, 1], strides = [1, 1]} : vector<2x8xf32> to vector<2x1xf32>
    %305 = vector.broadcast %304 : vector<2x1xf32> to vector<2x32xf32>
    %306 = vector.broadcast %5 : vector<1x32xf32> to vector<2x32xf32>
    %307 = arith.mulf %305, %306 : vector<2x32xf32>
    %308 = vector.extract_strided_slice %300 {offsets = [0, 5], sizes = [2, 1], strides = [1, 1]} : vector<2x8xf32> to vector<2x1xf32>
    %309 = vector.broadcast %308 : vector<2x1xf32> to vector<2x32xf32>
    %310 = vector.broadcast %6 : vector<1x32xf32> to vector<2x32xf32>
    %311 = arith.mulf %309, %310 : vector<2x32xf32>
    %312 = vector.extract_strided_slice %300 {offsets = [0, 6], sizes = [2, 1], strides = [1, 1]} : vector<2x8xf32> to vector<2x1xf32>
    %313 = vector.broadcast %312 : vector<2x1xf32> to vector<2x32xf32>
    %314 = vector.broadcast %7 : vector<1x32xf32> to vector<2x32xf32>
    %315 = arith.mulf %313, %314 : vector<2x32xf32>
    %316 = vector.extract_strided_slice %300 {offsets = [0, 7], sizes = [2, 1], strides = [1, 1]} : vector<2x8xf32> to vector<2x1xf32>
    %317 = vector.broadcast %316 : vector<2x1xf32> to vector<2x32xf32>
    %318 = vector.broadcast %8 : vector<1x32xf32> to vector<2x32xf32>
    %319 = arith.mulf %317, %318 : vector<2x32xf32>
    %320 = vector.extract_strided_slice %300 {offsets = [0, 0], sizes = [2, 1], strides = [1, 1]} : vector<2x8xf32> to vector<2x1xf32>
    %321 = vector.broadcast %320 : vector<2x1xf32> to vector<2x32xf32>
    %322 = vector.broadcast %9 : vector<1x32xf32> to vector<2x32xf32>
    %323 = arith.mulf %321, %322 : vector<2x32xf32>
    %324 = vector.extract_strided_slice %300 {offsets = [0, 1], sizes = [2, 1], strides = [1, 1]} : vector<2x8xf32> to vector<2x1xf32>
    %325 = vector.broadcast %324 : vector<2x1xf32> to vector<2x32xf32>
    %326 = vector.broadcast %10 : vector<1x32xf32> to vector<2x32xf32>
    %327 = arith.mulf %325, %326 : vector<2x32xf32>
    %328 = vector.extract_strided_slice %300 {offsets = [0, 2], sizes = [2, 1], strides = [1, 1]} : vector<2x8xf32> to vector<2x1xf32>
    %329 = vector.broadcast %328 : vector<2x1xf32> to vector<2x32xf32>
    %330 = vector.broadcast %11 : vector<1x32xf32> to vector<2x32xf32>
    %331 = arith.mulf %329, %330 : vector<2x32xf32>
    %332 = vector.extract_strided_slice %300 {offsets = [0, 3], sizes = [2, 1], strides = [1, 1]} : vector<2x8xf32> to vector<2x1xf32>
    %333 = vector.broadcast %332 : vector<2x1xf32> to vector<2x32xf32>
    %334 = vector.broadcast %12 : vector<1x32xf32> to vector<2x32xf32>
    %335 = arith.mulf %333, %334 : vector<2x32xf32>
    %336 = arith.addf %76, %307 : vector<2x32xf32>
    %337 = arith.addf %311, %315 : vector<2x32xf32>
    %338 = arith.addf %319, %323 : vector<2x32xf32>
    %339 = arith.addf %327, %331 : vector<2x32xf32>
    %340 = arith.addf %336, %337 : vector<2x32xf32>
    %341 = arith.addf %338, %339 : vector<2x32xf32>
    %342 = arith.addf %340, %341 : vector<2x32xf32>
    %343 = arith.addf %342, %335 : vector<2x32xf32>
    %344 = math.tanh %343 : vector<2x32xf32>
    %345 = vector.extract_strided_slice %344 {offsets = [0, 0], sizes = [2, 8], strides = [1, 1]} : vector<2x32xf32> to vector<2x8xf32>
    %cst_26 = arith.constant 5.000000e-01 : f32
    %346 = vector.broadcast %cst_26 : f32 to vector<2x8xf32>
    %347 = arith.mulf %345, %346 : vector<2x8xf32>
    %cst_27 = arith.constant 5.000000e-01 : f32
    %348 = vector.broadcast %cst_27 : f32 to vector<2x8xf32>
    %349 = arith.addf %347, %348 : vector<2x8xf32>
    %350 = vector.extract_strided_slice %344 {offsets = [0, 8], sizes = [2, 8], strides = [1, 1]} : vector<2x32xf32> to vector<2x8xf32>
    %cst_28 = arith.constant 5.000000e-01 : f32
    %351 = vector.broadcast %cst_28 : f32 to vector<2x8xf32>
    %352 = arith.mulf %350, %351 : vector<2x8xf32>
    %cst_29 = arith.constant 5.000000e-01 : f32
    %353 = vector.broadcast %cst_29 : f32 to vector<2x8xf32>
    %354 = arith.addf %352, %353 : vector<2x8xf32>
    %355 = vector.extract_strided_slice %344 {offsets = [0, 16], sizes = [2, 8], strides = [1, 1]} : vector<2x32xf32> to vector<2x8xf32>
    %356 = vector.extract_strided_slice %344 {offsets = [0, 24], sizes = [2, 8], strides = [1, 1]} : vector<2x32xf32> to vector<2x8xf32>
    %cst_30 = arith.constant 5.000000e-01 : f32
    %357 = vector.broadcast %cst_30 : f32 to vector<2x8xf32>
    %358 = arith.mulf %356, %357 : vector<2x8xf32>
    %cst_31 = arith.constant 5.000000e-01 : f32
    %359 = vector.broadcast %cst_31 : f32 to vector<2x8xf32>
    %360 = arith.addf %358, %359 : vector<2x8xf32>
    %361 = arith.mulf %354, %298 : vector<2x8xf32>
    %362 = arith.mulf %349, %355 : vector<2x8xf32>
    %363 = arith.addf %361, %362 : vector<2x8xf32>
    %364 = math.tanh %363 : vector<2x8xf32>
    %365 = arith.mulf %360, %364 : vector<2x8xf32>
    %366 = vector.broadcast %16 : vector<1x8xf32> to vector<2x8xf32>
    %367 = arith.mulf %365, %366 : vector<2x8xf32>
    %368 = arith.addf %303, %367 : vector<2x8xf32>
    %369 = vector.extract_strided_slice %365 {offsets = [0, 4], sizes = [2, 1], strides = [1, 1]} : vector<2x8xf32> to vector<2x1xf32>
    %370 = vector.broadcast %369 : vector<2x1xf32> to vector<2x32xf32>
    %371 = vector.broadcast %5 : vector<1x32xf32> to vector<2x32xf32>
    %372 = arith.mulf %370, %371 : vector<2x32xf32>
    %373 = vector.extract_strided_slice %365 {offsets = [0, 5], sizes = [2, 1], strides = [1, 1]} : vector<2x8xf32> to vector<2x1xf32>
    %374 = vector.broadcast %373 : vector<2x1xf32> to vector<2x32xf32>
    %375 = vector.broadcast %6 : vector<1x32xf32> to vector<2x32xf32>
    %376 = arith.mulf %374, %375 : vector<2x32xf32>
    %377 = vector.extract_strided_slice %365 {offsets = [0, 6], sizes = [2, 1], strides = [1, 1]} : vector<2x8xf32> to vector<2x1xf32>
    %378 = vector.broadcast %377 : vector<2x1xf32> to vector<2x32xf32>
    %379 = vector.broadcast %7 : vector<1x32xf32> to vector<2x32xf32>
    %380 = arith.mulf %378, %379 : vector<2x32xf32>
    %381 = vector.extract_strided_slice %365 {offsets = [0, 7], sizes = [2, 1], strides = [1, 1]} : vector<2x8xf32> to vector<2x1xf32>
    %382 = vector.broadcast %381 : vector<2x1xf32> to vector<2x32xf32>
    %383 = vector.broadcast %8 : vector<1x32xf32> to vector<2x32xf32>
    %384 = arith.mulf %382, %383 : vector<2x32xf32>
    %385 = vector.extract_strided_slice %365 {offsets = [0, 0], sizes = [2, 1], strides = [1, 1]} : vector<2x8xf32> to vector<2x1xf32>
    %386 = vector.broadcast %385 : vector<2x1xf32> to vector<2x32xf32>
    %387 = vector.broadcast %9 : vector<1x32xf32> to vector<2x32xf32>
    %388 = arith.mulf %386, %387 : vector<2x32xf32>
    %389 = vector.extract_strided_slice %365 {offsets = [0, 1], sizes = [2, 1], strides = [1, 1]} : vector<2x8xf32> to vector<2x1xf32>
    %390 = vector.broadcast %389 : vector<2x1xf32> to vector<2x32xf32>
    %391 = vector.broadcast %10 : vector<1x32xf32> to vector<2x32xf32>
    %392 = arith.mulf %390, %391 : vector<2x32xf32>
    %393 = vector.extract_strided_slice %365 {offsets = [0, 2], sizes = [2, 1], strides = [1, 1]} : vector<2x8xf32> to vector<2x1xf32>
    %394 = vector.broadcast %393 : vector<2x1xf32> to vector<2x32xf32>
    %395 = vector.broadcast %11 : vector<1x32xf32> to vector<2x32xf32>
    %396 = arith.mulf %394, %395 : vector<2x32xf32>
    %397 = vector.extract_strided_slice %365 {offsets = [0, 3], sizes = [2, 1], strides = [1, 1]} : vector<2x8xf32> to vector<2x1xf32>
    %398 = vector.broadcast %397 : vector<2x1xf32> to vector<2x32xf32>
    %399 = vector.broadcast %12 : vector<1x32xf32> to vector<2x32xf32>
    %400 = arith.mulf %398, %399 : vector<2x32xf32>
    %401 = arith.addf %87, %372 : vector<2x32xf32>
    %402 = arith.addf %376, %380 : vector<2x32xf32>
    %403 = arith.addf %384, %388 : vector<2x32xf32>
    %404 = arith.addf %392, %396 : vector<2x32xf32>
    %405 = arith.addf %401, %402 : vector<2x32xf32>
    %406 = arith.addf %403, %404 : vector<2x32xf32>
    %407 = arith.addf %405, %406 : vector<2x32xf32>
    %408 = arith.addf %407, %400 : vector<2x32xf32>
    %409 = math.tanh %408 : vector<2x32xf32>
    %410 = vector.extract_strided_slice %409 {offsets = [0, 0], sizes = [2, 8], strides = [1, 1]} : vector<2x32xf32> to vector<2x8xf32>
    %cst_32 = arith.constant 5.000000e-01 : f32
    %411 = vector.broadcast %cst_32 : f32 to vector<2x8xf32>
    %412 = arith.mulf %410, %411 : vector<2x8xf32>
    %cst_33 = arith.constant 5.000000e-01 : f32
    %413 = vector.broadcast %cst_33 : f32 to vector<2x8xf32>
    %414 = arith.addf %412, %413 : vector<2x8xf32>
    %415 = vector.extract_strided_slice %409 {offsets = [0, 8], sizes = [2, 8], strides = [1, 1]} : vector<2x32xf32> to vector<2x8xf32>
    %cst_34 = arith.constant 5.000000e-01 : f32
    %416 = vector.broadcast %cst_34 : f32 to vector<2x8xf32>
    %417 = arith.mulf %415, %416 : vector<2x8xf32>
    %cst_35 = arith.constant 5.000000e-01 : f32
    %418 = vector.broadcast %cst_35 : f32 to vector<2x8xf32>
    %419 = arith.addf %417, %418 : vector<2x8xf32>
    %420 = vector.extract_strided_slice %409 {offsets = [0, 16], sizes = [2, 8], strides = [1, 1]} : vector<2x32xf32> to vector<2x8xf32>
    %421 = vector.extract_strided_slice %409 {offsets = [0, 24], sizes = [2, 8], strides = [1, 1]} : vector<2x32xf32> to vector<2x8xf32>
    %cst_36 = arith.constant 5.000000e-01 : f32
    %422 = vector.broadcast %cst_36 : f32 to vector<2x8xf32>
    %423 = arith.mulf %421, %422 : vector<2x8xf32>
    %cst_37 = arith.constant 5.000000e-01 : f32
    %424 = vector.broadcast %cst_37 : f32 to vector<2x8xf32>
    %425 = arith.addf %423, %424 : vector<2x8xf32>
    %426 = arith.mulf %419, %363 : vector<2x8xf32>
    %427 = arith.mulf %414, %420 : vector<2x8xf32>
    %428 = arith.addf %426, %427 : vector<2x8xf32>
    %429 = math.tanh %428 : vector<2x8xf32>
    %430 = arith.mulf %425, %429 : vector<2x8xf32>
    %431 = vector.broadcast %17 : vector<1x8xf32> to vector<2x8xf32>
    %432 = arith.mulf %430, %431 : vector<2x8xf32>
    %433 = arith.addf %368, %432 : vector<2x8xf32>
    %434 = vector.extract_strided_slice %430 {offsets = [0, 4], sizes = [2, 1], strides = [1, 1]} : vector<2x8xf32> to vector<2x1xf32>
    %435 = vector.broadcast %434 : vector<2x1xf32> to vector<2x32xf32>
    %436 = vector.broadcast %5 : vector<1x32xf32> to vector<2x32xf32>
    %437 = arith.mulf %435, %436 : vector<2x32xf32>
    %438 = vector.extract_strided_slice %430 {offsets = [0, 5], sizes = [2, 1], strides = [1, 1]} : vector<2x8xf32> to vector<2x1xf32>
    %439 = vector.broadcast %438 : vector<2x1xf32> to vector<2x32xf32>
    %440 = vector.broadcast %6 : vector<1x32xf32> to vector<2x32xf32>
    %441 = arith.mulf %439, %440 : vector<2x32xf32>
    %442 = vector.extract_strided_slice %430 {offsets = [0, 6], sizes = [2, 1], strides = [1, 1]} : vector<2x8xf32> to vector<2x1xf32>
    %443 = vector.broadcast %442 : vector<2x1xf32> to vector<2x32xf32>
    %444 = vector.broadcast %7 : vector<1x32xf32> to vector<2x32xf32>
    %445 = arith.mulf %443, %444 : vector<2x32xf32>
    %446 = vector.extract_strided_slice %430 {offsets = [0, 7], sizes = [2, 1], strides = [1, 1]} : vector<2x8xf32> to vector<2x1xf32>
    %447 = vector.broadcast %446 : vector<2x1xf32> to vector<2x32xf32>
    %448 = vector.broadcast %8 : vector<1x32xf32> to vector<2x32xf32>
    %449 = arith.mulf %447, %448 : vector<2x32xf32>
    %450 = vector.extract_strided_slice %430 {offsets = [0, 0], sizes = [2, 1], strides = [1, 1]} : vector<2x8xf32> to vector<2x1xf32>
    %451 = vector.broadcast %450 : vector<2x1xf32> to vector<2x32xf32>
    %452 = vector.broadcast %9 : vector<1x32xf32> to vector<2x32xf32>
    %453 = arith.mulf %451, %452 : vector<2x32xf32>
    %454 = vector.extract_strided_slice %430 {offsets = [0, 1], sizes = [2, 1], strides = [1, 1]} : vector<2x8xf32> to vector<2x1xf32>
    %455 = vector.broadcast %454 : vector<2x1xf32> to vector<2x32xf32>
    %456 = vector.broadcast %10 : vector<1x32xf32> to vector<2x32xf32>
    %457 = arith.mulf %455, %456 : vector<2x32xf32>
    %458 = vector.extract_strided_slice %430 {offsets = [0, 2], sizes = [2, 1], strides = [1, 1]} : vector<2x8xf32> to vector<2x1xf32>
    %459 = vector.broadcast %458 : vector<2x1xf32> to vector<2x32xf32>
    %460 = vector.broadcast %11 : vector<1x32xf32> to vector<2x32xf32>
    %461 = arith.mulf %459, %460 : vector<2x32xf32>
    %462 = vector.extract_strided_slice %430 {offsets = [0, 3], sizes = [2, 1], strides = [1, 1]} : vector<2x8xf32> to vector<2x1xf32>
    %463 = vector.broadcast %462 : vector<2x1xf32> to vector<2x32xf32>
    %464 = vector.broadcast %12 : vector<1x32xf32> to vector<2x32xf32>
    %465 = arith.mulf %463, %464 : vector<2x32xf32>
    %466 = arith.addf %98, %437 : vector<2x32xf32>
    %467 = arith.addf %441, %445 : vector<2x32xf32>
    %468 = arith.addf %449, %453 : vector<2x32xf32>
    %469 = arith.addf %457, %461 : vector<2x32xf32>
    %470 = arith.addf %466, %467 : vector<2x32xf32>
    %471 = arith.addf %468, %469 : vector<2x32xf32>
    %472 = arith.addf %470, %471 : vector<2x32xf32>
    %473 = arith.addf %472, %465 : vector<2x32xf32>
    %474 = math.tanh %473 : vector<2x32xf32>
    %475 = vector.extract_strided_slice %474 {offsets = [0, 0], sizes = [2, 8], strides = [1, 1]} : vector<2x32xf32> to vector<2x8xf32>
    %cst_38 = arith.constant 5.000000e-01 : f32
    %476 = vector.broadcast %cst_38 : f32 to vector<2x8xf32>
    %477 = arith.mulf %475, %476 : vector<2x8xf32>
    %cst_39 = arith.constant 5.000000e-01 : f32
    %478 = vector.broadcast %cst_39 : f32 to vector<2x8xf32>
    %479 = arith.addf %477, %478 : vector<2x8xf32>
    %480 = vector.extract_strided_slice %474 {offsets = [0, 8], sizes = [2, 8], strides = [1, 1]} : vector<2x32xf32> to vector<2x8xf32>
    %cst_40 = arith.constant 5.000000e-01 : f32
    %481 = vector.broadcast %cst_40 : f32 to vector<2x8xf32>
    %482 = arith.mulf %480, %481 : vector<2x8xf32>
    %cst_41 = arith.constant 5.000000e-01 : f32
    %483 = vector.broadcast %cst_41 : f32 to vector<2x8xf32>
    %484 = arith.addf %482, %483 : vector<2x8xf32>
    %485 = vector.extract_strided_slice %474 {offsets = [0, 16], sizes = [2, 8], strides = [1, 1]} : vector<2x32xf32> to vector<2x8xf32>
    %486 = vector.extract_strided_slice %474 {offsets = [0, 24], sizes = [2, 8], strides = [1, 1]} : vector<2x32xf32> to vector<2x8xf32>
    %cst_42 = arith.constant 5.000000e-01 : f32
    %487 = vector.broadcast %cst_42 : f32 to vector<2x8xf32>
    %488 = arith.mulf %486, %487 : vector<2x8xf32>
    %cst_43 = arith.constant 5.000000e-01 : f32
    %489 = vector.broadcast %cst_43 : f32 to vector<2x8xf32>
    %490 = arith.addf %488, %489 : vector<2x8xf32>
    %491 = arith.mulf %484, %428 : vector<2x8xf32>
    %492 = arith.mulf %479, %485 : vector<2x8xf32>
    %493 = arith.addf %491, %492 : vector<2x8xf32>
    %494 = math.tanh %493 : vector<2x8xf32>
    %495 = arith.mulf %490, %494 : vector<2x8xf32>
    %496 = vector.broadcast %18 : vector<1x8xf32> to vector<2x8xf32>
    %497 = arith.mulf %495, %496 : vector<2x8xf32>
    %498 = arith.addf %433, %497 : vector<2x8xf32>
    %499 = vector.extract_strided_slice %495 {offsets = [0, 4], sizes = [2, 1], strides = [1, 1]} : vector<2x8xf32> to vector<2x1xf32>
    %500 = vector.broadcast %499 : vector<2x1xf32> to vector<2x32xf32>
    %501 = vector.broadcast %5 : vector<1x32xf32> to vector<2x32xf32>
    %502 = arith.mulf %500, %501 : vector<2x32xf32>
    %503 = vector.extract_strided_slice %495 {offsets = [0, 5], sizes = [2, 1], strides = [1, 1]} : vector<2x8xf32> to vector<2x1xf32>
    %504 = vector.broadcast %503 : vector<2x1xf32> to vector<2x32xf32>
    %505 = vector.broadcast %6 : vector<1x32xf32> to vector<2x32xf32>
    %506 = arith.mulf %504, %505 : vector<2x32xf32>
    %507 = vector.extract_strided_slice %495 {offsets = [0, 6], sizes = [2, 1], strides = [1, 1]} : vector<2x8xf32> to vector<2x1xf32>
    %508 = vector.broadcast %507 : vector<2x1xf32> to vector<2x32xf32>
    %509 = vector.broadcast %7 : vector<1x32xf32> to vector<2x32xf32>
    %510 = arith.mulf %508, %509 : vector<2x32xf32>
    %511 = vector.extract_strided_slice %495 {offsets = [0, 7], sizes = [2, 1], strides = [1, 1]} : vector<2x8xf32> to vector<2x1xf32>
    %512 = vector.broadcast %511 : vector<2x1xf32> to vector<2x32xf32>
    %513 = vector.broadcast %8 : vector<1x32xf32> to vector<2x32xf32>
    %514 = arith.mulf %512, %513 : vector<2x32xf32>
    %515 = vector.extract_strided_slice %495 {offsets = [0, 0], sizes = [2, 1], strides = [1, 1]} : vector<2x8xf32> to vector<2x1xf32>
    %516 = vector.broadcast %515 : vector<2x1xf32> to vector<2x32xf32>
    %517 = vector.broadcast %9 : vector<1x32xf32> to vector<2x32xf32>
    %518 = arith.mulf %516, %517 : vector<2x32xf32>
    %519 = vector.extract_strided_slice %495 {offsets = [0, 1], sizes = [2, 1], strides = [1, 1]} : vector<2x8xf32> to vector<2x1xf32>
    %520 = vector.broadcast %519 : vector<2x1xf32> to vector<2x32xf32>
    %521 = vector.broadcast %10 : vector<1x32xf32> to vector<2x32xf32>
    %522 = arith.mulf %520, %521 : vector<2x32xf32>
    %523 = vector.extract_strided_slice %495 {offsets = [0, 2], sizes = [2, 1], strides = [1, 1]} : vector<2x8xf32> to vector<2x1xf32>
    %524 = vector.broadcast %523 : vector<2x1xf32> to vector<2x32xf32>
    %525 = vector.broadcast %11 : vector<1x32xf32> to vector<2x32xf32>
    %526 = arith.mulf %524, %525 : vector<2x32xf32>
    %527 = vector.extract_strided_slice %495 {offsets = [0, 3], sizes = [2, 1], strides = [1, 1]} : vector<2x8xf32> to vector<2x1xf32>
    %528 = vector.broadcast %527 : vector<2x1xf32> to vector<2x32xf32>
    %529 = vector.broadcast %12 : vector<1x32xf32> to vector<2x32xf32>
    %530 = arith.mulf %528, %529 : vector<2x32xf32>
    %531 = arith.addf %109, %502 : vector<2x32xf32>
    %532 = arith.addf %506, %510 : vector<2x32xf32>
    %533 = arith.addf %514, %518 : vector<2x32xf32>
    %534 = arith.addf %522, %526 : vector<2x32xf32>
    %535 = arith.addf %531, %532 : vector<2x32xf32>
    %536 = arith.addf %533, %534 : vector<2x32xf32>
    %537 = arith.addf %535, %536 : vector<2x32xf32>
    %538 = arith.addf %537, %530 : vector<2x32xf32>
    %539 = math.tanh %538 : vector<2x32xf32>
    %540 = vector.extract_strided_slice %539 {offsets = [0, 0], sizes = [2, 8], strides = [1, 1]} : vector<2x32xf32> to vector<2x8xf32>
    %cst_44 = arith.constant 5.000000e-01 : f32
    %541 = vector.broadcast %cst_44 : f32 to vector<2x8xf32>
    %542 = arith.mulf %540, %541 : vector<2x8xf32>
    %cst_45 = arith.constant 5.000000e-01 : f32
    %543 = vector.broadcast %cst_45 : f32 to vector<2x8xf32>
    %544 = arith.addf %542, %543 : vector<2x8xf32>
    %545 = vector.extract_strided_slice %539 {offsets = [0, 8], sizes = [2, 8], strides = [1, 1]} : vector<2x32xf32> to vector<2x8xf32>
    %cst_46 = arith.constant 5.000000e-01 : f32
    %546 = vector.broadcast %cst_46 : f32 to vector<2x8xf32>
    %547 = arith.mulf %545, %546 : vector<2x8xf32>
    %cst_47 = arith.constant 5.000000e-01 : f32
    %548 = vector.broadcast %cst_47 : f32 to vector<2x8xf32>
    %549 = arith.addf %547, %548 : vector<2x8xf32>
    %550 = vector.extract_strided_slice %539 {offsets = [0, 16], sizes = [2, 8], strides = [1, 1]} : vector<2x32xf32> to vector<2x8xf32>
    %551 = vector.extract_strided_slice %539 {offsets = [0, 24], sizes = [2, 8], strides = [1, 1]} : vector<2x32xf32> to vector<2x8xf32>
    %cst_48 = arith.constant 5.000000e-01 : f32
    %552 = vector.broadcast %cst_48 : f32 to vector<2x8xf32>
    %553 = arith.mulf %551, %552 : vector<2x8xf32>
    %cst_49 = arith.constant 5.000000e-01 : f32
    %554 = vector.broadcast %cst_49 : f32 to vector<2x8xf32>
    %555 = arith.addf %553, %554 : vector<2x8xf32>
    %556 = arith.mulf %549, %493 : vector<2x8xf32>
    %557 = arith.mulf %544, %550 : vector<2x8xf32>
    %558 = arith.addf %556, %557 : vector<2x8xf32>
    %559 = math.tanh %558 : vector<2x8xf32>
    %560 = arith.mulf %555, %559 : vector<2x8xf32>
    %561 = vector.broadcast %19 : vector<1x8xf32> to vector<2x8xf32>
    %562 = arith.mulf %560, %561 : vector<2x8xf32>
    %563 = arith.addf %498, %562 : vector<2x8xf32>
    %564 = vector.extract_strided_slice %560 {offsets = [0, 4], sizes = [2, 1], strides = [1, 1]} : vector<2x8xf32> to vector<2x1xf32>
    %565 = vector.broadcast %564 : vector<2x1xf32> to vector<2x32xf32>
    %566 = vector.broadcast %5 : vector<1x32xf32> to vector<2x32xf32>
    %567 = arith.mulf %565, %566 : vector<2x32xf32>
    %568 = vector.extract_strided_slice %560 {offsets = [0, 5], sizes = [2, 1], strides = [1, 1]} : vector<2x8xf32> to vector<2x1xf32>
    %569 = vector.broadcast %568 : vector<2x1xf32> to vector<2x32xf32>
    %570 = vector.broadcast %6 : vector<1x32xf32> to vector<2x32xf32>
    %571 = arith.mulf %569, %570 : vector<2x32xf32>
    %572 = vector.extract_strided_slice %560 {offsets = [0, 6], sizes = [2, 1], strides = [1, 1]} : vector<2x8xf32> to vector<2x1xf32>
    %573 = vector.broadcast %572 : vector<2x1xf32> to vector<2x32xf32>
    %574 = vector.broadcast %7 : vector<1x32xf32> to vector<2x32xf32>
    %575 = arith.mulf %573, %574 : vector<2x32xf32>
    %576 = vector.extract_strided_slice %560 {offsets = [0, 7], sizes = [2, 1], strides = [1, 1]} : vector<2x8xf32> to vector<2x1xf32>
    %577 = vector.broadcast %576 : vector<2x1xf32> to vector<2x32xf32>
    %578 = vector.broadcast %8 : vector<1x32xf32> to vector<2x32xf32>
    %579 = arith.mulf %577, %578 : vector<2x32xf32>
    %580 = vector.extract_strided_slice %560 {offsets = [0, 0], sizes = [2, 1], strides = [1, 1]} : vector<2x8xf32> to vector<2x1xf32>
    %581 = vector.broadcast %580 : vector<2x1xf32> to vector<2x32xf32>
    %582 = vector.broadcast %9 : vector<1x32xf32> to vector<2x32xf32>
    %583 = arith.mulf %581, %582 : vector<2x32xf32>
    %584 = vector.extract_strided_slice %560 {offsets = [0, 1], sizes = [2, 1], strides = [1, 1]} : vector<2x8xf32> to vector<2x1xf32>
    %585 = vector.broadcast %584 : vector<2x1xf32> to vector<2x32xf32>
    %586 = vector.broadcast %10 : vector<1x32xf32> to vector<2x32xf32>
    %587 = arith.mulf %585, %586 : vector<2x32xf32>
    %588 = vector.extract_strided_slice %560 {offsets = [0, 2], sizes = [2, 1], strides = [1, 1]} : vector<2x8xf32> to vector<2x1xf32>
    %589 = vector.broadcast %588 : vector<2x1xf32> to vector<2x32xf32>
    %590 = vector.broadcast %11 : vector<1x32xf32> to vector<2x32xf32>
    %591 = arith.mulf %589, %590 : vector<2x32xf32>
    %592 = vector.extract_strided_slice %560 {offsets = [0, 3], sizes = [2, 1], strides = [1, 1]} : vector<2x8xf32> to vector<2x1xf32>
    %593 = vector.broadcast %592 : vector<2x1xf32> to vector<2x32xf32>
    %594 = vector.broadcast %12 : vector<1x32xf32> to vector<2x32xf32>
    %595 = arith.mulf %593, %594 : vector<2x32xf32>
    %596 = vector.broadcast %4 : vector<1x32xf32> to vector<2x32xf32>
    %597 = arith.addf %596, %567 : vector<2x32xf32>
    %598 = arith.addf %571, %575 : vector<2x32xf32>
    %599 = arith.addf %579, %583 : vector<2x32xf32>
    %600 = arith.addf %587, %591 : vector<2x32xf32>
    %601 = arith.addf %597, %598 : vector<2x32xf32>
    %602 = arith.addf %599, %600 : vector<2x32xf32>
    %603 = arith.addf %601, %602 : vector<2x32xf32>
    %604 = arith.addf %603, %595 : vector<2x32xf32>
    %605 = math.tanh %604 : vector<2x32xf32>
    %606 = vector.extract_strided_slice %605 {offsets = [0, 0], sizes = [2, 8], strides = [1, 1]} : vector<2x32xf32> to vector<2x8xf32>
    %cst_50 = arith.constant 5.000000e-01 : f32
    %607 = vector.broadcast %cst_50 : f32 to vector<2x8xf32>
    %608 = arith.mulf %606, %607 : vector<2x8xf32>
    %cst_51 = arith.constant 5.000000e-01 : f32
    %609 = vector.broadcast %cst_51 : f32 to vector<2x8xf32>
    %610 = arith.addf %608, %609 : vector<2x8xf32>
    %611 = vector.extract_strided_slice %605 {offsets = [0, 8], sizes = [2, 8], strides = [1, 1]} : vector<2x32xf32> to vector<2x8xf32>
    %cst_52 = arith.constant 5.000000e-01 : f32
    %612 = vector.broadcast %cst_52 : f32 to vector<2x8xf32>
    %613 = arith.mulf %611, %612 : vector<2x8xf32>
    %cst_53 = arith.constant 5.000000e-01 : f32
    %614 = vector.broadcast %cst_53 : f32 to vector<2x8xf32>
    %615 = arith.addf %613, %614 : vector<2x8xf32>
    %616 = vector.extract_strided_slice %605 {offsets = [0, 16], sizes = [2, 8], strides = [1, 1]} : vector<2x32xf32> to vector<2x8xf32>
    %617 = vector.extract_strided_slice %605 {offsets = [0, 24], sizes = [2, 8], strides = [1, 1]} : vector<2x32xf32> to vector<2x8xf32>
    %cst_54 = arith.constant 5.000000e-01 : f32
    %618 = vector.broadcast %cst_54 : f32 to vector<2x8xf32>
    %619 = arith.mulf %617, %618 : vector<2x8xf32>
    %cst_55 = arith.constant 5.000000e-01 : f32
    %620 = vector.broadcast %cst_55 : f32 to vector<2x8xf32>
    %621 = arith.addf %619, %620 : vector<2x8xf32>
    %622 = arith.mulf %615, %558 : vector<2x8xf32>
    %623 = arith.mulf %610, %616 : vector<2x8xf32>
    %624 = arith.addf %622, %623 : vector<2x8xf32>
    %625 = math.tanh %624 : vector<2x8xf32>
    %626 = arith.mulf %621, %625 : vector<2x8xf32>
    %627 = vector.broadcast %20 : vector<1x8xf32> to vector<2x8xf32>
    %628 = arith.mulf %626, %627 : vector<2x8xf32>
    %629 = arith.addf %563, %628 : vector<2x8xf32>
    %cst_56 = arith.constant dense<0.000000e+00> : vector<2xf32>
    %630 = vector.multi_reduction <add>, %629, %cst_56 [1] : vector<2x8xf32> to vector<2xf32>
    %631 = vector.shape_cast %630 : vector<2xf32> to vector<2x1xf32>
    %632 = vector.broadcast %21 : vector<1x1xf32> to vector<2x1xf32>
    %633 = arith.addf %631, %632 : vector<2x1xf32>
    %634 = arith.negf %633 : vector<2x1xf32>
    %635 = math.exp %634 : vector<2x1xf32>
    %cst_57 = arith.constant 1.000000e+00 : f32
    %636 = vector.broadcast %cst_57 : f32 to vector<2x1xf32>
    %637 = arith.addf %636, %635 : vector<2x1xf32>
    %638 = arith.divf %636, %637 : vector<2x1xf32>
    %c0_58 = arith.constant 0 : index
    %c0_59 = arith.constant 0 : index
    %639 = vector.load %arg2[%c0_58, %c0_59] : memref<2x1xf32, #tpu.memory_space<vmem>>, vector<2x1xf32>
    tpu.vector_store %arg2[%c0_58, %c0_59], %638 {strides = array<i32>} : memref<2x1xf32, #tpu.memory_space<vmem>>, vector<2x1xf32>,
    return
  }
}

</mosaic_0001>

<bundles_post_ra>
// kernel: lstm_pallas.1
= control target key start
LH: loop header
LB: loop body
LE: loop exit
PB: predicated region body
PF: predicated region fallthrough
CT: control target
= control target key end

     0   :  { %v960_v0 = vmov 0   ;;  %v961_v2 = vmov 1   ;;  %v20_v3 = vlaneseq  ;;  %v963_v19 = vmov 2   ;;  %s967_s13 = smov 24   ;;  %s969_s14 = smov 8   ;;  %s1414_s0 = inlined_call_operand.vmem [shape: f32[2,16], index: 0, kind: input, shape index: {}]   ;;  %s1415_s1 = inlined_call_operand.vmem [shape: f32[24,32], index: 1, kind: input, shape index: {}]   ;;  %s1416_s2 = inlined_call_operand.vmem [shape: f32[2,1], index: 2, kind: output, shape index: {}]  }
   0x1   :  { %844 = vset.pattern.permute.xlu0 %v960_v0  ;;  %v1008_v1 = vld [vmem:[%s1414_s0] sm:$0x3]  ;;  %s962_s0 = smov 112   ;;  %846 = vset.pattern.permute.xlu1 %v963_v19  ;;  %v964_v20 = vmov 3   ;;  %vm127_vm0 = vcmask 31744   ;;  %v965_v22 = vmov 1.0  }
   0x2   :  { %17 = vperm.xlu0 %844, %v1008_v1   ;;  %v1012_v4 = vshrl.u32 %v20_v3, 7  ;;  %v1020_v6 = vld [vmem:[%s1415_s1] sm:$0xff]  ;;  %v128_v23 = vsel %vm127_vm0, 0.0, %v965_v22  ;;  %v966_v29 = vmov 30   ;;  %v968_v31 = vmov 28   ;;  %s974_s15 = smov 16  }
   0x3   :  { %v970_v34 = vmov 29   ;;  %v971_v35 = vmov 31   ;;  %v976_v22 = vmov 24   ;;  %vm792_vm1 = vcmask 58368  }
   0x4   :  { %v1015_v5 = vsub.s32 0, %v1012_v4  ;;  %v1027_v8 = vsub.s32 2, %v1012_v4  ;;  %v1030_v9 = vsub.s32 1, %v1012_v4  ;;  %v1055_v38 = vsub.s32 3, %v1012_v4 }
   0x5   :  { %v170_v40 = vsub.s32 5, %v1012_v4  ;;  %v161_v41 = vsub.s32 4, %v1012_v4  ;;  %v179_v49 = vsub.s32 6, %v1012_v4  ;;  %vm807_vm2 = vcmask 1024  }
   0x6   :  { %845 = vset.pattern.permute.xlu0 %v961_v2  ;;  %v1024_v7 = vrot.slane %v1020_v6, %v1015_v5  ;;  %v1034_v11 = vrot.slane %v1020_v6, %v1027_v8  ;;  %v1039_v13 = vrot.slane %v1020_v6, %v1030_v9  ;;  %v137_v24 = vrot.slane %v128_v23, %v1015_v5 }
   0x7   :  { %26 = vperm.xlu0 %845, %v1008_v1   ;;  %v1063_v44 = vrot.slane %v1020_v6, %v1055_v38  ;;  %v1068_v46 = vrot.slane %v1020_v6, %v170_v40  ;;  %v1073_v47 = vrot.slane %v1020_v6, %v161_v41  ;;  %v1082_v55 = vrot.slane %v1020_v6, %v179_v49 }
   0x8   :  { %v977_v23 = vmov 26  }
   0xb   :  { %847 = vset.pattern.permute.xlu0 %v964_v20 }
   0xc   :  { %46 = vperm.xlu0 %847, %v1008_v1  }
  0x10   :  { %850 = vset.pattern.permute.xlu0 %v966_v29 }
  0x7d   :  { %v18_v10 = vpop.permute.xlu0 %17 }
  0x7e   :  { %v24_v12 = vmul.f32 %v1024_v7, %v18_v10  ;;  %v972_v10 = vmov 5  }
  0x80   :  { %v38_v15 = vadd.f32 %v1034_v11, %v24_v12  ;;  %v973_v12 = vmov 4  }
  0x82   :  { %v27_v14 = vpop.permute.xlu0 %26 }
  0x83   :  { %v33_v16 = vmul.f32 %v1039_v13, %v27_v14 }
  0x85   :  { %v39_v17 = vadd.f32 %v38_v15, %v33_v16 }
  0x87   :  { %920 = vtanh.f32 %v39_v17  ;;  %v47_v39 = vpop.permute.xlu0 %46 }
  0x88   :  { %v49_v43 = vmul.f32 %v47_v39, %v1039_v13 }
  0x94   :  { %v921_v18 = vpop.eup %920 }
  0x95   :  { %130 = vrot.lane.b32.xlu1 %v921_v18, %s962_s0  ;;  %v125_v21 = vmul.f32 0.5, %v921_v18 }
  0x97   :  { %v126_v25 = vadd.f32 0.5, %v125_v21  ;;  %v975_v21 = vmov 25  }
 0x107   :  { %v131_v26 = vpop.permute.xlu1 %130 }
 0x108   :  { %v133_v27 = vmul.f32 %v131_v26, %v126_v25 }
 0x10a   :  { %v138_v28 = vmul.f32 %v137_v24, %v133_v27  ;;  %v978_v24 = vmov 27  }
 0x10c   :  { %922 = vtanh.f32 %v138_v28 }
 0x119   :  { %v923_v30 = vpop.eup %922 }
 0x11a   :  { %141 = vrot.lane.b32.xlu1 %v923_v30, %s967_s13 }
 0x11e   :  { %41 = vperm.xlu1 %846, %v1008_v1  }
 0x122   :  { %848 = vset.pattern.permute.xlu1 %v968_v31 }
 0x18c   :  { %v142_v32 = vpop.permute.xlu1 %141 }
 0x18d   :  { %v144_v33 = vmul.f32 %v142_v32, %v126_v25 }
 0x18f   :  { %165 = vperm.xlu0 %850, %v144_v33   ;;  %147 = vperm.xlu1 %848, %v144_v33  }
 0x193   :  { %190 = vrot.lane.b32.xlu0 %v138_v28, %s969_s14  ;;  %849 = vset.pattern.permute.xlu1 %v970_v34 }
 0x194   :  { %156 = vperm.xlu1 %849, %v144_v33   ;;  %853 = vset.pattern.permute.xlu0 %v972_v10 }
 0x198   :  { %851 = vset.pattern.permute.xlu1 %v971_v35 }
 0x199   :  { %174 = vperm.xlu1 %851, %v144_v33   ;;  %v42_v36 = vpop.permute.xlu1 %41  ;;  %v246_v33 = vsub.s32 7, %v1012_v4 }
 0x19a   :  { %v44_v37 = vmul.f32 %v42_v36, %v1024_v7 }
 0x19c   :  { %v50_v42 = vadd.f32 %v44_v37, %v1034_v11  ;;  %v1116_v37 = vld [vmem:[%s1415_s1 + $0x8] sm:$0xff] }
 0x19d   :  { %852 = vset.pattern.permute.xlu1 %v973_v12 }
 0x19e   :  { %v51_v50 = vadd.f32 %v50_v42, %v49_v43  ;;  %v1123_v43 = vrot.slane %v1020_v6, %v246_v33 }
 0x20a   :  { %v148_v45 = vpop.permute.xlu1 %147  ;;  %v166_v48 = vpop.permute.xlu0 %165 }
 0x20b   :  { %v154_v51 = vmul.f32 %v1063_v44, %v148_v45  ;;  %v172_v53 = vmul.f32 %v1068_v46, %v166_v48 }
 0x20d   :  { %v182_v56 = vadd.f32 %v154_v51, %v51_v50  ;;  %v1128_v50 = vrot.slane %v1116_v37, %v1015_v5  ;;  %v1132_v51 = vrot.slane %v1116_v37, %v1030_v9 }
 0x20e   :  { %v191_v14 = vpop.permute.xlu0 %190 }
 0x20f   :  { %v157_v52 = vpop.permute.xlu1 %156 }
 0x210   :  { %v163_v54 = vmul.f32 %v1073_v47, %v157_v52 }
 0x212   :  { %v183_v57 = vadd.f32 %v172_v53, %v163_v54 }
 0x214   :  { %v175_v58 = vpop.permute.xlu1 %174  ;;  %v184_v59 = vadd.f32 %v183_v57, %v182_v56 }
 0x215   :  { %v181_v60 = vmul.f32 %v1082_v55, %v175_v58 }
 0x217   :  { %v185_v61 = vadd.f32 %v184_v59, %v181_v60 }
 0x219   :  { %924 = vtanh.f32 %v185_v61 }
 0x226   :  { %v925_v62 = vpop.eup %924 }
 0x227   :  { %195 = vrot.lane.b32.xlu1 %v925_v62, %s962_s0  ;;  %v187_v63 = vmul.f32 0.5, %v925_v62  ;;  %v1142_v62 = vrot.slane %v1116_v37, %v1027_v8 }
 0x229   :  { %v188_v0 = vadd.f32 0.5, %v187_v63 }
 0x22b   :  { %v193_v15 = vmul.f32 %v191_v14, %v188_v0 }
 0x299   :  { %v196_v2 = vpop.permute.xlu1 %195 }
 0x29a   :  { %v198_v3 = vmul.f32 %v196_v2, %v188_v0 }
 0x29c   :  { %200 = vrot.lane.b32.xlu1 %v198_v3, %s969_s14 }
 0x2a0   :  { %53 = vperm.xlu1 %852, %v1008_v1  }
 0x2a4   :  { %854 = vset.pattern.permute.xlu1 %v968_v31 }
 0x30e   :  { %v201_v16 = vpop.permute.xlu1 %200 }
 0x30f   :  { %v1089_v17 = vadd.f32 %v201_v16, %v193_v15 }
 0x311   :  { %926 = vtanh.f32 %v1089_v17 }
 0x31b   :  { %v54_v25 = vpop.permute.xlu1 %53 }
 0x31c   :  { %v56_v32 = vmul.f32 %v54_v25, %v1024_v7 }
 0x31e   :  { %v927_v18 = vpop.eup %926  ;;  %v62_v39 = vadd.f32 %v56_v32, %v1034_v11 }
 0x31f   :  { %206 = vrot.lane.b32.xlu0 %v927_v18, %s974_s15 }
 0x323   :  { %58 = vperm.xlu0 %853, %v1008_v1  }
 0x327   :  { %856 = vset.pattern.permute.xlu0 %v966_v29 }
 0x391   :  { %v207_v19 = vpop.permute.xlu0 %206 }
 0x392   :  { %v1095_v20 = vmul.f32 %v207_v19, %v188_v0 }
 0x394   :  { %231 = vperm.xlu0 %856, %v1095_v20   ;;  %221 = vperm.xlu1 %854, %v1095_v20  }
 0x398   :  { %859 = vset.pattern.permute.xlu0 %v975_v21  ;;  %855 = vset.pattern.permute.xlu1 %v970_v34 }
 0x399   :  { %250 = vperm.xlu0 %859, %v1095_v20   ;;  %226 = vperm.xlu1 %855, %v1095_v20  }
 0x39d   :  { %857 = vset.pattern.permute.xlu1 %v971_v35 }
 0x39e   :  { %236 = vperm.xlu1 %857, %v1095_v20   ;;  %v59_v28 = vpop.permute.xlu0 %58 }
 0x39f   :  { %v61_v42 = vmul.f32 %v59_v28, %v1039_v13  ;;  %v979_v28 = vmov 7  }
 0x3a0   :  { %863 = vset.pattern.permute.xlu0 %v979_v28 }
 0x3a1   :  { %v63_v53 = vadd.f32 %v62_v39, %v61_v42 }
 0x3a2   :  { %858 = vset.pattern.permute.xlu1 %v976_v22 }
 0x3a3   :  { %241 = vperm.xlu1 %858, %v1095_v20  }
 0x3a7   :  { %860 = vset.pattern.permute.xlu1 %v977_v23 }
 0x3a8   :  { %259 = vperm.xlu1 %860, %v1095_v20  }
 0x3ac   :  { %861 = vset.pattern.permute.xlu1 %v978_v24 }
 0x3ad   :  { %268 = vperm.xlu1 %861, %v1095_v20  }
 0x40f   :  { %v222_v26 = vpop.permute.xlu1 %221  ;;  %v232_v36 = vpop.permute.xlu0 %231 }
 0x410   :  { %v224_v54 = vmul.f32 %v222_v26, %v1063_v44  ;;  %v234_v56 = vmul.f32 %v232_v36, %v1068_v46 }
 0x412   :  { %v276_v63 = vadd.f32 %v224_v54, %v63_v53 }
 0x414   :  { %v227_v27 = vpop.permute.xlu1 %226  ;;  %v251_v52 = vpop.permute.xlu0 %250 }
 0x415   :  { %v229_v48 = vmul.f32 %v227_v27, %v1073_v47  ;;  %v257_v59 = vmul.f32 %v1128_v50, %v251_v52 }
 0x417   :  { %v277_v58 = vadd.f32 %v234_v56, %v229_v48 }
 0x419   :  { %v237_v30 = vpop.permute.xlu1 %236  ;;  %v280_v3 = vadd.f32 %v277_v58, %v276_v63 }
 0x41a   :  { %v239_v60 = vmul.f32 %v237_v30, %v1082_v55  ;;  %v980_v30 = vmov 6  }
 0x41b   :  { %862 = vset.pattern.permute.xlu1 %v980_v30 }
 0x41e   :  { %v242_v45 = vpop.permute.xlu1 %241 }
 0x41f   :  { %v248_v6 = vmul.f32 %v1123_v43, %v242_v45 }
 0x421   :  { %v278_v0 = vadd.f32 %v248_v6, %v239_v60 }
 0x423   :  { %v260_v57 = vpop.permute.xlu1 %259 }
 0x424   :  { %v266_v61 = vmul.f32 %v1132_v51, %v260_v57 }
 0x426   :  { %v279_v2 = vadd.f32 %v266_v61, %v257_v59 }
 0x428   :  { %v281_v10 = vadd.f32 %v279_v2, %v278_v0  ;;  %v269_v12 = vpop.permute.xlu1 %268 }
 0x429   :  { %v275_v14 = vmul.f32 %v1142_v62, %v269_v12 }
 0x42a   :  { %v282_v15 = vadd.f32 %v281_v10, %v280_v3 }
 0x42c   :  { %v283_v16 = vadd.f32 %v282_v15, %v275_v14 }
 0x42e   :  { %928 = vtanh.f32 %v283_v16 }
 0x43b   :  { %v929_v18 = vpop.eup %928 }
 0x43c   :  { %289 = vrot.lane.b32.xlu0 %v929_v18, %s962_s0  ;;  %v285_v19 = vmul.f32 0.5, %v929_v18 }
 0x43e   :  { %v286_v25 = vadd.f32 0.5, %v285_v19 }
 0x440   :  { %v287_v32 = vmul.f32 %v286_v25, %v1089_v17 }
 0x4ae   :  { %v290_v26 = vpop.permute.xlu0 %289 }
 0x4af   :  { %v292_v27 = vmul.f32 %v290_v26, %v286_v25 }
 0x4b1   :  { %294 = vrot.lane.b32.xlu1 %v292_v27, %s969_s14 }
 0x4b5   :  { %65 = vperm.xlu1 %862, %v1008_v1  }
 0x4b9   :  { %864 = vset.pattern.permute.xlu1 %v968_v31 }
 0x523   :  { %v295_v36 = vpop.permute.xlu1 %294 }
 0x524   :  { %v1150_v39 = vadd.f32 %v295_v36, %v287_v32 }
 0x526   :  { %930 = vtanh.f32 %v1150_v39 }
 0x530   :  { %v66_v17 = vpop.permute.xlu1 %65 }
 0x531   :  { %v68_v6 = vmul.f32 %v66_v17, %v1024_v7 }
 0x533   :  { %v931_v42 = vpop.eup %930  ;;  %v74_v58 = vadd.f32 %v68_v6, %v1034_v11  ;;  %v982_v6 = vmov 8  }
 0x534   :  { %300 = vrot.lane.b32.xlu0 %v931_v42, %s974_s15 }
 0x538   :  { %70 = vperm.xlu0 %863, %v1008_v1  }
 0x53c   :  { %866 = vset.pattern.permute.xlu0 %v966_v29 }
 0x5a6   :  { %v301_v45 = vpop.permute.xlu0 %300 }
 0x5a7   :  { %v1156_v48 = vmul.f32 %v301_v45, %v286_v25 }
 0x5a9   :  { %326 = vperm.xlu0 %866, %v1156_v48   ;;  %316 = vperm.xlu1 %864, %v1156_v48  }
 0x5ad   :  { %869 = vset.pattern.permute.xlu0 %v975_v21  ;;  %865 = vset.pattern.permute.xlu1 %v970_v34 }
 0x5ae   :  { %341 = vperm.xlu0 %869, %v1156_v48   ;;  %321 = vperm.xlu1 %865, %v1156_v48  }
 0x5b2   :  { %867 = vset.pattern.permute.xlu1 %v971_v35 }
 0x5b3   :  { %331 = vperm.xlu1 %867, %v1156_v48   ;;  %v71_v54 = vpop.permute.xlu0 %70 }
 0x5b4   :  { %v73_v59 = vmul.f32 %v71_v54, %v1039_v13 }
 0x5b6   :  { %v75_v0 = vadd.f32 %v74_v58, %v73_v59 }
 0x5b7   :  { %868 = vset.pattern.permute.xlu1 %v976_v22 }
 0x5b8   :  { %336 = vperm.xlu1 %868, %v1156_v48  }
 0x5bc   :  { %870 = vset.pattern.permute.xlu1 %v977_v23 }
 0x5bd   :  { %346 = vperm.xlu1 %870, %v1156_v48  }
 0x5c1   :  { %871 = vset.pattern.permute.xlu1 %v978_v24 }
 0x5c2   :  { %351 = vperm.xlu1 %871, %v1156_v48  }
 0x5c6   :  { %872 = vset.pattern.permute.xlu1 %v982_v6 }
 0x624   :  { %v317_v52 = vpop.permute.xlu1 %316  ;;  %v327_v57 = vpop.permute.xlu0 %326 }
 0x625   :  { %v319_v2 = vmul.f32 %v317_v52, %v1063_v44  ;;  %v329_v3 = vmul.f32 %v327_v57, %v1068_v46 }
 0x627   :  { %v355_v19 = vadd.f32 %v319_v2, %v75_v0 }
 0x629   :  { %v322_v53 = vpop.permute.xlu1 %321  ;;  %v342_v63 = vpop.permute.xlu0 %341 }
 0x62a   :  { %v324_v61 = vmul.f32 %v322_v53, %v1073_v47  ;;  %v344_v15 = vmul.f32 %v342_v63, %v1128_v50 }
 0x62c   :  { %v356_v14 = vadd.f32 %v329_v3, %v324_v61 }
 0x62e   :  { %v332_v56 = vpop.permute.xlu1 %331  ;;  %v359_v27 = vadd.f32 %v356_v14, %v355_v19 }
 0x62f   :  { %v334_v16 = vmul.f32 %v332_v56, %v1082_v55  ;;  %v981_v56 = vmov 9  }
 0x630   :  { %873 = vset.pattern.permute.xlu0 %v981_v56 }
 0x633   :  { %v337_v60 = vpop.permute.xlu1 %336 }
 0x634   :  { %v339_v10 = vmul.f32 %v337_v60, %v1123_v43 }
 0x636   :  { %v357_v25 = vadd.f32 %v339_v10, %v334_v16 }
 0x638   :  { %v347_v12 = vpop.permute.xlu1 %346 }
 0x639   :  { %v349_v18 = vmul.f32 %v347_v12, %v1132_v51 }
 0x63b   :  { %v358_v26 = vadd.f32 %v349_v18, %v344_v15 }
 0x63d   :  { %v360_v28 = vadd.f32 %v358_v26, %v357_v25  ;;  %v352_v30 = vpop.permute.xlu1 %351 }
 0x63e   :  { %v354_v32 = vmul.f32 %v352_v30, %v1142_v62 }
 0x63f   :  { %v361_v36 = vadd.f32 %v360_v28, %v359_v27 }
 0x641   :  { %v362_v42 = vadd.f32 %v361_v36, %v354_v32 }
 0x643   :  { %932 = vtanh.f32 %v362_v42 }
 0x650   :  { %v933_v45 = vpop.eup %932 }
 0x651   :  { %368 = vrot.lane.b32.xlu0 %v933_v45, %s962_s0  ;;  %v364_v17 = vmul.f32 0.5, %v933_v45 }
 0x653   :  { %v365_v52 = vadd.f32 0.5, %v364_v17 }
 0x655   :  { %v366_v57 = vmul.f32 %v365_v52, %v1150_v39 }
 0x6c3   :  { %v369_v53 = vpop.permute.xlu0 %368 }
 0x6c4   :  { %v371_v54 = vmul.f32 %v369_v53, %v365_v52 }
 0x6c6   :  { %373 = vrot.lane.b32.xlu1 %v371_v54, %s969_s14 }
 0x6ca   :  { %77 = vperm.xlu1 %872, %v1008_v1  }
 0x6ce   :  { %874 = vset.pattern.permute.xlu1 %v968_v31 }
 0x738   :  { %v374_v58 = vpop.permute.xlu1 %373 }
 0x739   :  { %v1188_v59 = vadd.f32 %v374_v58, %v366_v57 }
 0x73b   :  { %934 = vtanh.f32 %v1188_v59 }
 0x745   :  { %v78_v39 = vpop.permute.xlu1 %77 }
 0x746   :  { %v80_v12 = vmul.f32 %v78_v39, %v1024_v7 }
 0x748   :  { %v935_v60 = vpop.eup %934  ;;  %v86_v15 = vadd.f32 %v80_v12, %v1034_v11  ;;  %v983_v12 = vmov 11  }
 0x749   :  { %379 = vrot.lane.b32.xlu0 %v935_v60, %s974_s15 }
 0x74d   :  { %82 = vperm.xlu0 %873, %v1008_v1  }
 0x751   :  { %876 = vset.pattern.permute.xlu0 %v966_v29 }
 0x7bb   :  { %v380_v61 = vpop.permute.xlu0 %379 }
 0x7bc   :  { %v1194_v63 = vmul.f32 %v380_v61, %v365_v52 }
 0x7be   :  { %405 = vperm.xlu0 %876, %v1194_v63   ;;  %395 = vperm.xlu1 %874, %v1194_v63  }
 0x7c2   :  { %879 = vset.pattern.permute.xlu0 %v975_v21  ;;  %875 = vset.pattern.permute.xlu1 %v970_v34 }
 0x7c3   :  { %420 = vperm.xlu0 %879, %v1194_v63   ;;  %400 = vperm.xlu1 %875, %v1194_v63  }
 0x7c7   :  { %877 = vset.pattern.permute.xlu1 %v971_v35  ;;  %883 = vset.pattern.permute.xlu0 %v983_v12 }
 0x7c8   :  { %410 = vperm.xlu1 %877, %v1194_v63   ;;  %v83_v3 = vpop.permute.xlu0 %82 }
 0x7c9   :  { %v85_v16 = vmul.f32 %v83_v3, %v1039_v13 }
 0x7cb   :  { %v87_v26 = vadd.f32 %v86_v15, %v85_v16 }
 0x7cc   :  { %878 = vset.pattern.permute.xlu1 %v976_v22 }
 0x7cd   :  { %415 = vperm.xlu1 %878, %v1194_v63  }
 0x7d1   :  { %880 = vset.pattern.permute.xlu1 %v977_v23 }
 0x7d2   :  { %425 = vperm.xlu1 %880, %v1194_v63  }
 0x7d6   :  { %881 = vset.pattern.permute.xlu1 %v978_v24 }
 0x7d7   :  { %430 = vperm.xlu1 %881, %v1194_v63  }
 0x839   :  { %v396_v0 = vpop.permute.xlu1 %395  ;;  %v406_v14 = vpop.permute.xlu0 %405 }
 0x83a   :  { %v398_v27 = vmul.f32 %v396_v0, %v1063_v44  ;;  %v408_v28 = vmul.f32 %v406_v14, %v1068_v46  ;;  %v984_v14 = vmov 10  }
 0x83b   :  { %882 = vset.pattern.permute.xlu1 %v984_v14 }
 0x83c   :  { %v434_v52 = vadd.f32 %v398_v27, %v87_v26 }
 0x83e   :  { %v401_v2 = vpop.permute.xlu1 %400  ;;  %v421_v25 = vpop.permute.xlu0 %420 }
 0x83f   :  { %v403_v19 = vmul.f32 %v401_v2, %v1073_v47  ;;  %v423_v42 = vmul.f32 %v421_v25, %v1128_v50 }
 0x841   :  { %v435_v36 = vadd.f32 %v408_v28, %v403_v19 }
 0x843   :  { %v411_v10 = vpop.permute.xlu1 %410  ;;  %v438_v56 = vadd.f32 %v435_v36, %v434_v52 }
 0x844   :  { %v413_v45 = vmul.f32 %v411_v10, %v1082_v55 }
 0x848   :  { %v416_v18 = vpop.permute.xlu1 %415 }
 0x849   :  { %v418_v30 = vmul.f32 %v416_v18, %v1123_v43 }
 0x84b   :  { %v436_v53 = vadd.f32 %v418_v30, %v413_v45 }
 0x84d   :  { %v426_v32 = vpop.permute.xlu1 %425 }
 0x84e   :  { %v428_v17 = vmul.f32 %v426_v32, %v1132_v51 }
 0x850   :  { %v437_v54 = vadd.f32 %v428_v17, %v423_v42 }
 0x852   :  { %v439_v6 = vadd.f32 %v437_v54, %v436_v53  ;;  %v431_v57 = vpop.permute.xlu1 %430 }
 0x853   :  { %v433_v58 = vmul.f32 %v431_v57, %v1142_v62 }
 0x854   :  { %v440_v60 = vadd.f32 %v439_v6, %v438_v56 }
 0x856   :  { %v441_v61 = vadd.f32 %v440_v60, %v433_v58 }
 0x858   :  { %936 = vtanh.f32 %v441_v61 }
 0x865   :  { %v937_v39 = vpop.eup %936 }
 0x866   :  { %447 = vrot.lane.b32.xlu0 %v937_v39, %s962_s0  ;;  %v443_v0 = vmul.f32 0.5, %v937_v39 }
 0x868   :  { %v444_v2 = vadd.f32 0.5, %v443_v0 }
 0x86a   :  { %v445_v15 = vmul.f32 %v444_v2, %v1188_v59 }
 0x8d8   :  { %v448_v3 = vpop.permute.xlu0 %447 }
 0x8d9   :  { %v450_v10 = vmul.f32 %v448_v3, %v444_v2 }
 0x8db   :  { %452 = vrot.lane.b32.xlu1 %v450_v10, %s969_s14 }
 0x8df   :  { %89 = vperm.xlu1 %882, %v1008_v1  }
 0x8e3   :  { %884 = vset.pattern.permute.xlu1 %v968_v31 }
 0x94d   :  { %v453_v16 = vpop.permute.xlu1 %452 }
 0x94e   :  { %v1226_v18 = vadd.f32 %v453_v16, %v445_v15 }
 0x950   :  { %938 = vtanh.f32 %v1226_v18 }
 0x95a   :  { %v90_v59 = vpop.permute.xlu1 %89 }
 0x95b   :  { %v92_v36 = vmul.f32 %v90_v59, %v1024_v7 }
 0x95d   :  { %v939_v19 = vpop.eup %938  ;;  %v98_v45 = vadd.f32 %v92_v36, %v1034_v11 }
 0x95e   :  { %458 = vrot.lane.b32.xlu0 %v939_v19, %s974_s15 }
 0x962   :  { %94 = vperm.xlu0 %883, %v1008_v1  }
 0x966   :  { %886 = vset.pattern.permute.xlu0 %v966_v29 }
 0x9d0   :  { %v459_v25 = vpop.permute.xlu0 %458 }
 0x9d1   :  { %v1232_v26 = vmul.f32 %v459_v25, %v444_v2 }
 0x9d3   :  { %484 = vperm.xlu0 %886, %v1232_v26   ;;  %474 = vperm.xlu1 %884, %v1232_v26  }
 0x9d7   :  { %889 = vset.pattern.permute.xlu0 %v975_v21  ;;  %885 = vset.pattern.permute.xlu1 %v970_v34 }
 0x9d8   :  { %499 = vperm.xlu0 %889, %v1232_v26   ;;  %479 = vperm.xlu1 %885, %v1232_v26  }
 0x9dc   :  { %887 = vset.pattern.permute.xlu1 %v971_v35 }
 0x9dd   :  { %489 = vperm.xlu1 %887, %v1232_v26   ;;  %v95_v30 = vpop.permute.xlu0 %94 }
 0x9de   :  { %v97_v17 = vmul.f32 %v95_v30, %v1039_v13 }
 0x9e0   :  { %v99_v56 = vadd.f32 %v98_v45, %v97_v17  ;;  %v986_v45 = vmov 12  }
 0x9e1   :  { %888 = vset.pattern.permute.xlu1 %v976_v22 }
 0x9e2   :  { %494 = vperm.xlu1 %888, %v1232_v26  }
 0x9e6   :  { %890 = vset.pattern.permute.xlu1 %v977_v23 }
 0x9e7   :  { %504 = vperm.xlu1 %890, %v1232_v26  }
 0x9eb   :  { %891 = vset.pattern.permute.xlu1 %v978_v24 }
 0x9ec   :  { %509 = vperm.xlu1 %891, %v1232_v26  }
 0x9f0   :  { %892 = vset.pattern.permute.xlu1 %v986_v45 }
 0xa4e   :  { %v475_v27 = vpop.permute.xlu1 %474  ;;  %v485_v42 = vpop.permute.xlu0 %484 }
 0xa4f   :  { %v477_v6 = vmul.f32 %v475_v27, %v1063_v44  ;;  %v487_v57 = vmul.f32 %v485_v42, %v1068_v46  ;;  %v985_v42 = vmov 13  }
 0xa50   :  { %893 = vset.pattern.permute.xlu0 %v985_v42 }
 0xa51   :  { %v513_v3 = vadd.f32 %v477_v6, %v99_v56 }
 0xa53   :  { %v480_v28 = vpop.permute.xlu1 %479  ;;  %v500_v54 = vpop.permute.xlu0 %499 }
 0xa54   :  { %v482_v53 = vmul.f32 %v480_v28, %v1073_v47  ;;  %v502_v39 = vmul.f32 %v500_v54, %v1128_v50 }
 0xa56   :  { %v514_v61 = vadd.f32 %v487_v57, %v482_v53 }
 0xa58   :  { %v490_v32 = vpop.permute.xlu1 %489  ;;  %v517_v14 = vadd.f32 %v514_v61, %v513_v3 }
 0xa59   :  { %v492_v0 = vmul.f32 %v490_v32, %v1082_v55 }
 0xa5d   :  { %v495_v52 = vpop.permute.xlu1 %494 }
 0xa5e   :  { %v497_v58 = vmul.f32 %v495_v52, %v1123_v43 }
 0xa60   :  { %v515_v10 = vadd.f32 %v497_v58, %v492_v0 }
 0xa62   :  { %v505_v60 = vpop.permute.xlu1 %504 }
 0xa63   :  { %v507_v2 = vmul.f32 %v505_v60, %v1132_v51 }
 0xa65   :  { %v516_v12 = vadd.f32 %v507_v2, %v502_v39 }
 0xa67   :  { %v518_v15 = vadd.f32 %v516_v12, %v515_v10  ;;  %v510_v16 = vpop.permute.xlu1 %509 }
 0xa68   :  { %v512_v19 = vmul.f32 %v510_v16, %v1142_v62 }
 0xa69   :  { %v519_v25 = vadd.f32 %v518_v15, %v517_v14 }
 0xa6b   :  { %v520_v59 = vadd.f32 %v519_v25, %v512_v19 }
 0xa6d   :  { %940 = vtanh.f32 %v520_v59 }
 0xa7a   :  { %v941_v27 = vpop.eup %940 }
 0xa7b   :  { %526 = vrot.lane.b32.xlu0 %v941_v27, %s962_s0  ;;  %v522_v28 = vmul.f32 0.5, %v941_v27 }
 0xa7d   :  { %v523_v30 = vadd.f32 0.5, %v522_v28 }
 0xa7f   :  { %v524_v17 = vmul.f32 %v523_v30, %v1226_v18 }
 0xaed   :  { %v527_v36 = vpop.permute.xlu0 %526 }
 0xaee   :  { %v529_v32 = vmul.f32 %v527_v36, %v523_v30 }
 0xaf0   :  { %531 = vrot.lane.b32.xlu1 %v529_v32, %s969_s14 }
 0xaf4   :  { %101 = vperm.xlu1 %892, %v1008_v1  }
 0xaf8   :  { %894 = vset.pattern.permute.xlu1 %v968_v31 }
 0xb62   :  { %v532_v52 = vpop.permute.xlu1 %531 }
 0xb63   :  { %v1264_v53 = vadd.f32 %v532_v52, %v524_v17 }
 0xb65   :  { %942 = vtanh.f32 %v1264_v53 }
 0xb6f   :  { %v102_v18 = vpop.permute.xlu1 %101 }
 0xb70   :  { %v104_v39 = vmul.f32 %v102_v18, %v1024_v7 }
 0xb72   :  { %v943_v54 = vpop.eup %942  ;;  %v110_v2 = vadd.f32 %v104_v39, %v1034_v11 }
 0xb73   :  { %537 = vrot.lane.b32.xlu0 %v943_v54, %s974_s15 }
 0xb77   :  { %106 = vperm.xlu0 %893, %v1008_v1  }
 0xb7b   :  { %896 = vset.pattern.permute.xlu0 %v966_v29 }
 0xbe5   :  { %v538_v56 = vpop.permute.xlu0 %537 }
 0xbe6   :  { %v1270_v6 = vmul.f32 %v538_v56, %v523_v30 }
 0xbe8   :  { %563 = vperm.xlu0 %896, %v1270_v6   ;;  %553 = vperm.xlu1 %894, %v1270_v6  }
 0xbec   :  { %899 = vset.pattern.permute.xlu0 %v975_v21  ;;  %895 = vset.pattern.permute.xlu1 %v970_v34 }
 0xbed   :  { %578 = vperm.xlu0 %899, %v1270_v6   ;;  %558 = vperm.xlu1 %895, %v1270_v6  }
 0xbf1   :  { %897 = vset.pattern.permute.xlu1 %v971_v35 }
 0xbf2   :  { %568 = vperm.xlu1 %897, %v1270_v6   ;;  %v107_v60 = vpop.permute.xlu0 %106 }
 0xbf3   :  { %v109_v3 = vmul.f32 %v107_v60, %v1039_v13 }
 0xbf5   :  { %v111_v15 = vadd.f32 %v110_v2, %v109_v3  ;;  %v987_v2 = vmov 15   ;;  %v988_v3 = vmov 14  }
 0xbf6   :  { %898 = vset.pattern.permute.xlu1 %v976_v22  ;;  %903 = vset.pattern.permute.xlu0 %v987_v2 }
 0xbf7   :  { %573 = vperm.xlu1 %898, %v1270_v6  }
 0xbfb   :  { %900 = vset.pattern.permute.xlu1 %v977_v23 }
 0xbfc   :  { %583 = vperm.xlu1 %900, %v1270_v6  }
 0xc00   :  { %901 = vset.pattern.permute.xlu1 %v978_v24 }
 0xc01   :  { %588 = vperm.xlu1 %901, %v1270_v6  }
 0xc05   :  { %902 = vset.pattern.permute.xlu1 %v988_v3 }
 0xc63   :  { %v554_v57 = vpop.permute.xlu1 %553  ;;  %v564_v0 = vpop.permute.xlu0 %563 }
 0xc64   :  { %v556_v16 = vmul.f32 %v554_v57, %v1063_v44  ;;  %v566_v19 = vmul.f32 %v564_v0, %v1068_v46 }
 0xc66   :  { %v592_v32 = vadd.f32 %v556_v16, %v111_v15 }
 0xc68   :  { %v559_v58 = vpop.permute.xlu1 %558  ;;  %v579_v14 = vpop.permute.xlu0 %578 }
 0xc69   :  { %v561_v12 = vmul.f32 %v559_v58, %v1073_v47  ;;  %v581_v28 = vmul.f32 %v579_v14, %v1128_v50 }
 0xc6b   :  { %v593_v27 = vadd.f32 %v566_v19, %v561_v12 }
 0xc6d   :  { %v569_v61 = vpop.permute.xlu1 %568  ;;  %v596_v17 = vadd.f32 %v593_v27, %v592_v32 }
 0xc6e   :  { %v571_v30 = vmul.f32 %v569_v61, %v1082_v55 }
 0xc72   :  { %v574_v10 = vpop.permute.xlu1 %573 }
 0xc73   :  { %v576_v25 = vmul.f32 %v574_v10, %v1123_v43 }
 0xc75   :  { %v594_v42 = vadd.f32 %v576_v25, %v571_v30 }
 0xc77   :  { %v584_v59 = vpop.permute.xlu1 %583 }
 0xc78   :  { %v586_v36 = vmul.f32 %v584_v59, %v1132_v51 }
 0xc7a   :  { %v595_v45 = vadd.f32 %v586_v36, %v581_v28 }
 0xc7c   :  { %v597_v52 = vadd.f32 %v595_v45, %v594_v42  ;;  %v589_v54 = vpop.permute.xlu1 %588 }
 0xc7d   :  { %v591_v56 = vmul.f32 %v589_v54, %v1142_v62 }
 0xc7e   :  { %v598_v18 = vadd.f32 %v597_v52, %v596_v17 }
 0xc80   :  { %v599_v57 = vadd.f32 %v598_v18, %v591_v56 }
 0xc82   :  { %944 = vtanh.f32 %v599_v57 }
 0xc8f   :  { %v945_v58 = vpop.eup %944 }
 0xc90   :  { %605 = vrot.lane.b32.xlu0 %v945_v58, %s962_s0  ;;  %v601_v60 = vmul.f32 0.5, %v945_v58 }
 0xc92   :  { %v602_v39 = vadd.f32 0.5, %v601_v60 }
 0xc94   :  { %v603_v10 = vmul.f32 %v602_v39, %v1264_v53 }
 0xd02   :  { %v606_v0 = vpop.permute.xlu0 %605 }
 0xd03   :  { %v608_v61 = vmul.f32 %v606_v0, %v602_v39 }
 0xd05   :  { %610 = vrot.lane.b32.xlu1 %v608_v61, %s969_s14 }
 0xd09   :  { %113 = vperm.xlu1 %902, %v1008_v1  }
 0xd0d   :  { %904 = vset.pattern.permute.xlu1 %v968_v31 }
 0xd77   :  { %v611_v12 = vpop.permute.xlu1 %610 }
 0xd78   :  { %v613_v14 = vadd.f32 %v611_v12, %v603_v10 }
 0xd7a   :  { %946 = vtanh.f32 %v613_v14 }
 0xd87   :  { %v947_v15 = vpop.eup %946 }
 0xd88   :  { %616 = vrot.lane.b32.xlu0 %v947_v15, %s974_s15 }
 0xd8c   :  { %118 = vperm.xlu0 %903, %v1008_v1   ;;  %v114_v1 = vpop.permute.xlu1 %113 }
 0xd8d   :  { %v116_v27 = vmul.f32 %v114_v1, %v1024_v7 }
 0xd8f   :  { %v122_v30 = vadd.f32 %v116_v27, %v1034_v11 }
 0xd90   :  { %906 = vset.pattern.permute.xlu0 %v966_v29 }
 0xdfa   :  { %v617_v16 = vpop.permute.xlu0 %616 }
 0xdfb   :  { %v1305_v19 = vmul.f32 %v617_v16, %v602_v39 }
 0xdfd   :  { %642 = vperm.xlu0 %906, %v1305_v19   ;;  %632 = vperm.xlu1 %904, %v1305_v19  }
 0xe01   :  { %909 = vset.pattern.permute.xlu0 %v975_v21  ;;  %905 = vset.pattern.permute.xlu1 %v970_v34 }
 0xe02   :  { %657 = vperm.xlu0 %909, %v1305_v19   ;;  %637 = vperm.xlu1 %905, %v1305_v19  }
 0xe06   :  { %907 = vset.pattern.permute.xlu1 %v971_v35  ;;  %913 = vset.pattern.permute.xlu0 %v970_v34 }
 0xe07   :  { %647 = vperm.xlu1 %907, %v1305_v19   ;;  %v119_v34 = vpop.permute.xlu0 %118 }
 0xe08   :  { %v121_v36 = vmul.f32 %v119_v34, %v1039_v13 }
 0xe0a   :  { %v123_v17 = vadd.f32 %v122_v30, %v121_v36 }
 0xe0b   :  { %908 = vset.pattern.permute.xlu1 %v976_v22 }
 0xe0c   :  { %652 = vperm.xlu1 %908, %v1305_v19  }
 0xe10   :  { %910 = vset.pattern.permute.xlu1 %v977_v23 }
 0xe11   :  { %662 = vperm.xlu1 %910, %v1305_v19  }
 0xe15   :  { %911 = vset.pattern.permute.xlu1 %v978_v24 }
 0xe16   :  { %667 = vperm.xlu1 %911, %v1305_v19  }
 0xe1a   :  { %912 = vset.pattern.permute.xlu1 %v968_v31 }
 0xe78   :  { %v633_v53 = vpop.permute.xlu1 %632  ;;  %v643_v28 = vpop.permute.xlu0 %642 }
 0xe79   :  { %v635_v52 = vmul.f32 %v633_v53, %v1063_v44  ;;  %v645_v31 = vmul.f32 %v643_v28, %v1068_v46 }
 0xe7b   :  { %v671_v13 = vadd.f32 %v635_v52, %v123_v17 }
 0xe7d   :  { %v638_v25 = vpop.permute.xlu1 %637  ;;  %v658_v45 = vpop.permute.xlu0 %657 }
 0xe7e   :  { %v640_v42 = vmul.f32 %v638_v25, %v1073_v47  ;;  %v660_v7 = vmul.f32 %v658_v45, %v1128_v50 }
 0xe80   :  { %v672_v18 = vadd.f32 %v645_v31, %v640_v42 }
 0xe82   :  { %v648_v59 = vpop.permute.xlu1 %647  ;;  %v675_v0 = vadd.f32 %v672_v18, %v671_v13 }
 0xe83   :  { %v650_v57 = vmul.f32 %v648_v59, %v1082_v55 }
 0xe87   :  { %v653_v32 = vpop.permute.xlu1 %652 }
 0xe88   :  { %v655_v54 = vmul.f32 %v653_v32, %v1123_v43 }
 0xe8a   :  { %v673_v60 = vadd.f32 %v655_v54, %v650_v57 }
 0xe8c   :  { %v663_v56 = vpop.permute.xlu1 %662 }
 0xe8d   :  { %v665_v58 = vmul.f32 %v663_v56, %v1132_v51 }
 0xe8f   :  { %v674_v39 = vadd.f32 %v665_v58, %v660_v7 }
 0xe91   :  { %v676_v61 = vadd.f32 %v674_v39, %v673_v60  ;;  %v668_v2 = vpop.permute.xlu1 %667 }
 0xe92   :  { %v670_v3 = vmul.f32 %v668_v2, %v1142_v62 }
 0xe93   :  { %v677_v10 = vadd.f32 %v676_v61, %v675_v0 }
 0xe95   :  { %v678_v12 = vadd.f32 %v677_v10, %v670_v3 }
 0xe97   :  { %948 = vtanh.f32 %v678_v12 }
 0xea4   :  { %v949_v15 = vpop.eup %948 }
 0xea5   :  { %684 = vrot.lane.b32.xlu0 %v949_v15, %s962_s0  ;;  %v680_v16 = vmul.f32 0.5, %v949_v15 }
 0xea7   :  { %v681_v1 = vadd.f32 0.5, %v680_v16 }
 0xea9   :  { %v682_v34 = vmul.f32 %v681_v1, %v613_v14  ;;  %v213_v14 = vrot.slane %v1116_v37, %v1055_v38 }
 0xf17   :  { %v685_v53 = vpop.permute.xlu0 %684 }
 0xf18   :  { %v687_v25 = vmul.f32 %v685_v53, %v681_v1 }
 0xf1a   :  { %689 = vrot.lane.b32.xlu1 %v687_v25, %s969_s14 }
 0xf8c   :  { %v690_v59 = vpop.permute.xlu1 %689 }
 0xf8d   :  { %v1336_v27 = vadd.f32 %v690_v59, %v682_v34 }
 0xf8f   :  { %950 = vtanh.f32 %v1336_v27 }
 0xf9c   :  { %v951_v28 = vpop.eup %950 }
 0xf9d   :  { %695 = vrot.lane.b32.xlu0 %v951_v28, %s974_s15 }
0x100f   :  { %v696_v30 = vpop.permute.xlu0 %695 }
0x1010   :  { %v1340_v36 = vmul.f32 %v696_v30, %v681_v1 }
0x1012   :  { %716 = vperm.xlu0 %913, %v1340_v36   ;;  %711 = vperm.xlu1 %912, %v1340_v36  }
0x1016   :  { %916 = vset.pattern.permute.xlu0 %v976_v22  ;;  %914 = vset.pattern.permute.xlu1 %v966_v29  ;;  %v386_v29 = vrot.slane %v1116_v37, %v170_v40 }
0x1017   :  { %731 = vperm.xlu0 %916, %v1340_v36   ;;  %721 = vperm.xlu1 %914, %v1340_v36  }
0x101b   :  { %919 = vset.pattern.permute.xlu0 %v978_v24  ;;  %915 = vset.pattern.permute.xlu1 %v971_v35  ;;  %v544_v35 = vrot.slane %v1116_v37, %v246_v33 }
0x101c   :  { %746 = vperm.xlu0 %919, %v1340_v36   ;;  %726 = vperm.xlu1 %915, %v1340_v36  }
0x1020   :  { %917 = vset.pattern.permute.xlu1 %v975_v21  ;;  %215 = vrot.lane.b32.xlu0 %v213_v14, %s967_s13  ;;  %v1368_v21 = vld [vmem:[%s1415_s1 + $0x10] sm:$0xff]  ;;  %s989_s1 = smov 104  }
0x1021   :  { %736 = vperm.xlu1 %917, %v1340_v36   ;;  %v702_v40 = vrot.slane %v1368_v21, %v1030_v9  ;;  %v623_v3 = vrot.slane %v1368_v21, %v1015_v5 }
0x1024   :  { %388 = vrot.lane.b32.xlu0 %v386_v29, %s967_s13 }
0x1025   :  { %918 = vset.pattern.permute.xlu1 %v977_v23 }
0x1026   :  { %741 = vperm.xlu1 %918, %v1340_v36  }
0x1028   :  { %546 = vrot.lane.b32.xlu0 %v544_v35, %s967_s13 }
0x102c   :  { %704 = vrot.lane.b32.xlu0 %v702_v40, %s967_s13 }
0x108d   :  { %v712_v22 = vpop.permute.xlu1 %711  ;;  %v717_v33 = vpop.permute.xlu0 %716 }
0x108e   :  { %v719_v17 = vmul.f32 %v717_v33, %v1073_v47  ;;  %v714_v52 = vmul.f32 %v712_v22, %v1063_v44 }
0x1090   :  { %v750_v57 = vadd.f32 %v714_v52, %v1034_v11  ;;  %v307_v11 = vrot.slane %v1116_v37, %v161_v41 }
0x1092   :  { %v722_v24 = vpop.permute.xlu1 %721  ;;  %v732_v45 = vpop.permute.xlu0 %731 }
0x1093   :  { %v724_v23 = vmul.f32 %v722_v24, %v1068_v46  ;;  %v734_v56 = vmul.f32 %v732_v45, %v1123_v43 }
0x1095   :  { %v751_v9 = vadd.f32 %v724_v23, %v719_v17 }
0x1097   :  { %v727_v32 = vpop.permute.xlu1 %726  ;;  %v747_v46 = vpop.permute.xlu0 %746  ;;  %v754_v60 = vadd.f32 %v751_v9, %v750_v57 }
0x1098   :  { %v729_v31 = vmul.f32 %v727_v32, %v1082_v55  ;;  %v749_v47 = vmul.f32 %v747_v46, %v1142_v62  ;;  %v465_v62 = vrot.slane %v1116_v37, %v179_v49 }
0x109a   :  { %v752_v58 = vadd.f32 %v734_v56, %v729_v31 }
0x109b   :  { %v216_v4 = vpop.permute.xlu0 %215 }
0x109c   :  { %v737_v42 = vpop.permute.xlu1 %736  ;;  %v218_v37 = vmul.f32 %v216_v4, %v1095_v20 }
0x109d   :  { %v739_v18 = vmul.f32 %v737_v42, %v1128_v50 }
0x109f   :  { %v389_v16 = vpop.permute.xlu0 %388 }
0x10a0   :  { %v391_v5 = vmul.f32 %v389_v16, %v1194_v63 }
0x10a1   :  { %v742_v54 = vpop.permute.xlu1 %741 }
0x10a2   :  { %v744_v7 = vmul.f32 %v742_v54, %v1132_v51  ;;  %v781_v51 = vrot.slane %v1368_v21, %v1027_v8 }
0x10a3   :  { %v547_v59 = vpop.permute.xlu0 %546 }
0x10a4   :  { %v753_v13 = vadd.f32 %v744_v7, %v739_v18  ;;  %783 = vrot.lane.b32.xlu0 %v781_v51, %s967_s13  ;;  %v549_v30 = vmul.f32 %v547_v59, %v1270_v6  ;;  %v799_v6 = vrot.slane %v1368_v21, %v1055_v38 }
0x10a6   :  { %v755_v39 = vadd.f32 %v753_v13, %v752_v58 }
0x10a7   :  { %v705_v35 = vpop.permute.xlu0 %704 }
0x10a8   :  { %v756_v44 = vadd.f32 %v755_v39, %v754_v60  ;;  %v707_v22 = vmul.f32 %v705_v35, %v1340_v36 }
0x10aa   :  { %v757_v0 = vadd.f32 %v756_v44, %v749_v47 }
0x10ac   :  { %952 = vtanh.f32 %v757_v0 }
0x10b9   :  { %v953_v55 = vpop.eup %952 }
0x10ba   :  { %763 = vrot.lane.b32.xlu1 %v953_v55, %s962_s0  ;;  %v759_v43 = vmul.f32 0.5, %v953_v55 }
0x10bc   :  { %v760_v61 = vadd.f32 0.5, %v759_v43 }
0x10be   :  { %v761_v41 = vmul.f32 %v760_v61, %v1336_v27 }
0x1116   :  { %v784_v20 = vpop.permute.xlu0 %783 }
0x112c   :  { %v764_v50 = vpop.permute.xlu1 %763 }
0x112d   :  { %v766_v2 = vmul.f32 %v764_v50, %v760_v61 }
0x112f   :  { %768 = vrot.lane.b32.xlu1 %v766_v2, %s969_s14 }
0x1133   :  { %309 = vrot.lane.b32.xlu1 %v307_v11, %s967_s13 }
0x1137   :  { %467 = vrot.lane.b32.xlu1 %v465_v62, %s967_s13 }
0x113b   :  { %625 = vrot.lane.b32.xlu1 %v623_v3, %s967_s13 }
0x11a1   :  { %v769_v10 = vpop.permute.xlu1 %768 }
0x11a2   :  { %v771_v12 = vadd.f32 %v769_v10, %v761_v41 }
0x11a4   :  { %954 = vtanh.f32 %v771_v12 }
0x11a5   :  { %v310_v15 = vpop.permute.xlu1 %309 }
0x11a6   :  { %v312_v49 = vmul.f32 %v310_v15, %v1156_v48 }
0x11a8   :  { %v313_v1 = vadd.f32 %v312_v49, %v218_v37 }
0x11a9   :  { %v468_v53 = vpop.permute.xlu1 %467 }
0x11aa   :  { %v392_v25 = vadd.f32 %v391_v5, %v313_v1  ;;  %v470_v34 = vmul.f32 %v468_v53, %v1232_v26 }
0x11ac   :  { %v471_v27 = vadd.f32 %v470_v34, %v392_v25 }
0x11ad   :  { %v626_v28 = vpop.permute.xlu1 %625 }
0x11ae   :  { %v550_v14 = vadd.f32 %v549_v30, %v471_v27  ;;  %v628_v29 = vmul.f32 %v626_v28, %v1305_v19 }
0x11b0   :  { %v629_v48 = vadd.f32 %v628_v29, %v550_v14 }
0x11b1   :  { %v955_v8 = vpop.eup %954 }
0x11b2   :  { %774 = vrot.lane.b32.xlu1 %v955_v8, %s974_s15  ;;  %v708_v32 = vadd.f32 %v707_v22, %v629_v48 }
0x1224   :  { %v775_v40 = vpop.permute.xlu1 %774 }
0x1225   :  { %v777_v24 = vmul.f32 %v775_v40, %v760_v61 }
0x1227   :  { %v786_v63 = vmul.f32 %v784_v20, %v777_v24 }
0x1229   :  { %v787_v33 = vadd.f32 %v786_v63, %v708_v32 }
0x122b   :  { %789 = vrot.lane.b32.xlu1 %v787_v33, %s989_s1 }
0x129d   :  { %v790_v26 = vpop.permute.xlu1 %789 }
0x129e   :  { %v793_v42 = vsel %vm792_vm1, %v790_v26, 0.0 }
0x129f   :  { %794 = vadd.xlane.f32.xlu0 %v793_v42 }
0x1328   :  { %v795_v19 = vpop.xlane.xlu0 %794 }
0x1329   :  { %v800_v23 = vadd.f32 %v799_v6, %v795_v19 }
0x132b   :  { %v813_v45 = vmul.f32 -1.442695, %v800_v23 }
0x132d   :  { %956 = vpow2.f32 %v813_v45 }
0x133a   :  { %v957_v17 = vpop.eup %956 }
0x133b   :  { %v804_v52 = vadd.f32 1.0, %v957_v17 }
0x133d   :  { %958 = vrcp.f32 %v804_v52 }
0x134a   :  { %v959_v36 = vpop.eup %958 }
0x134b   :  { %808 = vst.msk [vmem:[%s1416_s2] sm:$0x3] %vm807_vm2, %v959_v36 }

</bundles_post_ra>
